<compile_context>
chip_gen: v7x
topology: tpu7x:2x2x1
jax: 0.10.0
libtpu: 0.0.40
codegen_flags: <defaults>
</compile_context>

<pallas_src>
import functools

import jax
import jax.numpy as jnp
from jax import lax
from jax.experimental import pallas as pl
from jax.experimental.pallas import tpu as pltpu


def _vmem_limit_bytes():
    """Generation-aware scoped-VMEM budget (~half of physical VMEM).

    v5e/v6e: 128 MiB physical -> 64 MiB budget; v7x: 64 MiB -> 32 MiB.
    Falls back to a v7x-safe 32 MiB if the query is unavailable.
    """
    try:
        cap = int(pltpu.get_tpu_info().vmem_capacity_bytes)
        return max(32 * 1024 * 1024, min(cap // 2, 96 * 1024 * 1024))
    except Exception:  # non-TPU backend / API drift -> conservative default
        return 32 * 1024 * 1024


_VMEM_LIMIT = _vmem_limit_bytes()

# Tile targets (the attention tile is additionally capped by a VMEM estimate).
_TM, _TN, _TK = 512, 512, 512          # projection matmul tiles
_TQ, _TKV = 512, 512                   # attention query / kv tiles


def _sublane_align(dtype):
    """Sublane alignment matching the dtype packing (f32: 8, bf16: 16, i8: 32)."""
    return max(8, 32 // jnp.dtype(dtype).itemsize)


def _pick_tile(dim, target, align):
    """Largest tile <= target that divides `dim` and is a multiple of `align`.

    Falls back to the full dim (full-dim blocks are exempt from the (8, 128)
    block alignment rule), which also covers the small self-test shapes.
    """
    if dim <= target:
        return dim
    t = (target // align) * align
    while t >= align:
        if dim % t == 0:
            return t
        t -= align
    return dim


# ---------------------------------------------------------------------------
# Tiled projection kernels (MXU matmuls, f32 accumulation over the K axis)
# ---------------------------------------------------------------------------
def _matmul_kernel(x_ref, w_ref, o_ref, acc_ref):
    """Batched (no-bias) matmul: grid (P, M/tm, N/tn, K/tk); K axis last."""
    k = pl.program_id(3)

    @pl.when(k == 0)
    def _init():
        acc_ref[...] = jnp.zeros_like(acc_ref)

    acc_ref[...] += jnp.dot(x_ref[...], w_ref[...],
                            preferred_element_type=jnp.float32)

    @pl.when(k == pl.num_programs(3) - 1)
    def _finish():
        o_ref[...] = acc_ref[...].astype(o_ref.dtype)


def _matmul_bias_kernel(x_ref, w_ref, b_ref, o_ref, acc_ref):
    """Batched matmul + bias: grid (P, M/tm, N/tn, K/tk); K axis last."""
    k = pl.program_id(3)

    @pl.when(k == 0)
    def _init():
        acc_ref[...] = jnp.zeros_like(acc_ref)

    acc_ref[...] += jnp.dot(x_ref[...], w_ref[...],
                            preferred_element_type=jnp.float32)

    @pl.when(k == pl.num_programs(3) - 1)
    def _finish():
        o_ref[...] = (acc_ref[...] + b_ref[...]).astype(o_ref.dtype)


def fused_qkv_projection(x2d, w_stack):
    """x2d: (M, C), w_stack: (P, C, C) per-part (in, out) weights -> (P, M, C)."""
    M, K = x2d.shape
    P, K2, N = w_stack.shape
    assert K == K2
    dt = x2d.dtype
    itemsize = dt.itemsize
    tm = _pick_tile(M, _TM, _sublane_align(dt))
    tn = _pick_tile(N, _TN, 128)
    tk = _pick_tile(K, _TK, 128)
    grid = (P, M // tm, N // tn, K // tk)
    return pl.pallas_call(
        _matmul_kernel,
        out_shape=jax.ShapeDtypeStruct((P, M, N), dt),
        grid=grid,
        in_specs=[
            pl.BlockSpec((tm, tk), lambda p, i, j, k: (i, k)),
            pl.BlockSpec((None, tk, tn), lambda p, i, j, k: (p, k, j)),
        ],
        out_specs=pl.BlockSpec((None, tm, tn), lambda p, i, j, k: (p, i, j)),
        scratch_shapes=[pltpu.VMEM((tm, tn), jnp.float32)],
        compiler_params=pltpu.CompilerParams(
            dimension_semantics=("parallel", "parallel", "parallel",
                                 "arbitrary"),
            vmem_limit_bytes=_VMEM_LIMIT,
        ),
        cost_estimate=pl.CostEstimate(
            flops=2 * P * M * N * K,
            transcendentals=0,
            bytes_accessed=(P * (N // tn) * M * K        # x tile revisits
                            + (M // tm) * P * K * N      # weight revisits
                            + P * M * N) * itemsize,
        ),
    )(x2d, w_stack)


def batched_linear(x3, w3, b3):
    """x3: (P, M, K), w3: (P, K, N) in (in, out) layout, b3: (P, 1, N)."""
    P, M, K = x3.shape
    P2, K2, N = w3.shape
    assert P == P2 and K == K2
    dt = x3.dtype
    itemsize = dt.itemsize
    tm = _pick_tile(M, _TM, _sublane_align(dt))
    tn = _pick_tile(N, _TN, 128)
    tk = _pick_tile(K, _TK, 128)
    grid = (P, M // tm, N // tn, K // tk)
    return pl.pallas_call(
        _matmul_bias_kernel,
        out_shape=jax.ShapeDtypeStruct((P, M, N), dt),
        grid=grid,
        in_specs=[
            pl.BlockSpec((None, tm, tk), lambda p, i, j, k: (p, i, k)),
            pl.BlockSpec((None, tk, tn), lambda p, i, j, k: (p, k, j)),
            pl.BlockSpec((None, 1, tn), lambda p, i, j, k: (p, 0, j)),
        ],
        out_specs=pl.BlockSpec((None, tm, tn), lambda p, i, j, k: (p, i, j)),
        scratch_shapes=[pltpu.VMEM((tm, tn), jnp.float32)],
        compiler_params=pltpu.CompilerParams(
            dimension_semantics=("parallel", "parallel", "parallel",
                                 "arbitrary"),
            vmem_limit_bytes=_VMEM_LIMIT,
        ),
        cost_estimate=pl.CostEstimate(
            flops=2 * P * M * N * K,
            transcendentals=0,
            bytes_accessed=((N // tn) * P * M * K + (M // tm) * P * K * N
                            + P * M * N + P * N) * itemsize,
        ),
    )(x3, w3, b3)


# ---------------------------------------------------------------------------
# Flash-style multi-head cross attention (both directions in one call)
# ---------------------------------------------------------------------------
def _flash_attn_kernel(q_ref, k_ref, v_ref, o_ref,
                       q_sc, m_sc, l_sc, acc_sc, *, num_heads):
    """One (direction, batch, q-tile, kv-tile) step.

    q_ref: (tq, C), k_ref/v_ref: (tkv, C), o_ref: (tq, C); heads packed along
    channels.  Scratch: q_sc (H, tq, hd) head-split q; m/l (H, tq, 1) and
    acc (H, tq, hd) in f32.  Softmax scale is pre-folded into the weights.
    """
    ki = pl.program_id(3)
    tq, C = q_ref.shape
    hd = C // num_heads

    def split_heads(x):
        # (T, C) -> (H, T, hd) via static lane slices; feeds ONE batched
        # MXU matmul for all heads instead of per-head push/pop chains.
        return jnp.stack(
            [x[:, h * hd:(h + 1) * hd] for h in range(num_heads)], axis=0)

    @pl.when(ki == 0)
    def _init():
        m_sc[...] = jnp.full_like(m_sc, -jnp.inf)
        l_sc[...] = jnp.zeros_like(l_sc)
        acc_sc[...] = jnp.zeros_like(acc_sc)
        q_sc[...] = split_heads(q_ref[...])      # split q once per q tile

    k3 = split_heads(k_ref[...])                 # (H, tkv, hd)
    v3 = split_heads(v_ref[...])                 # (H, tkv, hd)

    # s[h, q, k] = sum_d q[h,q,d] * k[h,k,d]  (batched over heads on the MXU)
    s = lax.dot_general(q_sc[...], k3, (((2,), (2,)), ((0,), (0,))),
                        preferred_element_type=jnp.float32)       # (H, tq, tkv)

    m_prev = m_sc[...]
    m_new = jnp.maximum(m_prev, jnp.max(s, axis=-1, keepdims=True))  # (H,tq,1)
    alpha = jnp.exp(m_prev - m_new)
    p = jnp.exp(s - m_new)                                           # (H,tq,tkv)
    l_sc[...] = alpha * l_sc[...] + jnp.sum(p, axis=-1, keepdims=True)
    pv = lax.dot_general(p.astype(v3.dtype), v3, (((2,), (1,)), ((0,), (0,))),
                         preferred_element_type=jnp.float32)         # (H,tq,hd)
    acc_sc[...] = alpha * acc_sc[...] + pv
    m_sc[...] = m_new

    @pl.when(ki == pl.num_programs(3) - 1)
    def _finish():
        out3 = acc_sc[...] / l_sc[...]           # exact normalize (epilogue only)
        # Merge heads back onto the channel axis; ONE lane-dense (tq, C) store.
        o_ref[...] = jnp.concatenate(
            [out3[h] for h in range(num_heads)], axis=-1).astype(o_ref.dtype)


def flash_mha(qkv, *, num_heads):
    """qkv: (4, B, N, C), parts: 0 = q/k of x, 1 = v of x, 2 = q/k of y, 3 = v of y.

    Runs BOTH cross-attention directions (x <- qx,ky,vy and y <- qy,kx,vx) in
    one pallas_call; the leading grid axis d selects the parts through the
    index maps.  Returns (2, B, N, C) with heads already packed along channels.
    """
    P, B, N, C = qkv.shape
    assert P == 4 and C % num_heads == 0
    hd = C // num_heads
    dt = qkv.dtype
    itemsize = dt.itemsize
    align = _sublane_align(dt)

    # Cap the tile so double-buffered q/k/v/out tiles + f32 acc + head-split q
    # scratch stay inside ~60% of the scoped VMEM budget.
    per_row = C * (9 * itemsize + 4)
    t_cap = max(align, int(0.6 * _VMEM_LIMIT) // per_row)
    tq = _pick_tile(N, min(_TQ, t_cap), align)
    tkv = _pick_tile(N, min(_TKV, t_cap), align)
    grid = (2, B, N // tq, N // tkv)

    q_spec = pl.BlockSpec((None, None, tq, C),
                          lambda d, b, qi, ki: (2 * d, b, qi, 0))
    k_spec = pl.BlockSpec((None, None, tkv, C),
                          lambda d, b, qi, ki: (2 - 2 * d, b, ki, 0))
    v_spec = pl.BlockSpec((None, None, tkv, C),
                          lambda d, b, qi, ki: (3 - 2 * d, b, ki, 0))
    o_spec = pl.BlockSpec((None, None, tq, C),
                          lambda d, b, qi, ki: (d, b, qi, 0))

    return pl.pallas_call(
        functools.partial(_flash_attn_kernel, num_heads=num_heads),
        out_shape=jax.ShapeDtypeStruct((2, B, N, C), dt),
        grid=grid,
        in_specs=[q_spec, k_spec, v_spec],
        out_specs=o_spec,
        scratch_shapes=[
            pltpu.VMEM((num_heads, tq, hd), dt),            # head-split q
            pltpu.VMEM((num_heads, tq, 1), jnp.float32),    # running max m
            pltpu.VMEM((num_heads, tq, 1), jnp.float32),    # running sum l
            pltpu.VMEM((num_heads, tq, hd), jnp.float32),   # f32 accumulator
        ],
        compiler_params=pltpu.CompilerParams(
            dimension_semantics=("parallel", "parallel", "parallel",
                                 "arbitrary"),
            vmem_limit_bytes=_VMEM_LIMIT,
        ),
        cost_estimate=pl.CostEstimate(
            flops=8 * B * N * N * C,
            transcendentals=2 * B * num_heads * N * N,
            bytes_accessed=(2 * B * N * C                     # q
                            + 2 * (N // tq) * 2 * B * N * C   # k + v revisits
                            + 2 * B * N * C) * itemsize,      # output
        ),
    )(qkv, qkv, qkv)


# ---------------------------------------------------------------------------
# Module forward (glue in plain JAX, hot paths in Pallas)
# ---------------------------------------------------------------------------
def cross_attention_forward(params, x, y, num_heads):
    B, Nx, C = x.shape
    _, Ny, _ = y.shape
    del y  # never read before attention in the PyTorch reference
    # The reference reshapes qkv_y(x) with Ny -> implicitly requires Nx == Ny.
    assert Nx == Ny
    assert C % num_heads == 0

    xf = x.reshape(B * Nx, C)
    # One fused (C -> 4*C) projection; scale already folded into parts 0 / 2.
    qkv = fused_qkv_projection(xf, params["w_qkv4"])        # (4, B*Nx, C)
    qkv = qkv.reshape(4, B, Nx, C)

    # Both cross-attention directions in one call: (2, B, Nx, C)
    att = flash_mha(qkv, num_heads=num_heads)

    # Both output projections in one batched call: (2, B*Nx, C)
    proj = batched_linear(att.reshape(2, B * Nx, C),
                          params["w_proj"], params["b_proj"])
    x_out = proj[0].reshape(B, Nx, C)
    y_out = proj[1].reshape(B, Ny, C)
    return x_out, y_out


def init_params(key, dim):
    """Deterministic synthetic parameters in PyTorch weight layout (out, in)."""
    k1, k2, k3, k4, k5, k6 = jax.random.split(key, 6)
    s = 0.05
    return dict(
        w_qkv_x=jax.random.normal(k1, (2 * dim, dim), jnp.float32) * s,
        w_qkv_y=jax.random.normal(k2, (2 * dim, dim), jnp.float32) * s,
        w_proj_x=jax.random.normal(k3, (dim, dim), jnp.float32) * s,
        b_proj_x=jax.random.normal(k4, (dim,), jnp.float32) * s,
        w_proj_y=jax.random.normal(k5, (dim, dim), jnp.float32) * s,
        b_proj_y=jax.random.normal(k6, (dim,), jnp.float32) * s,
    )


def prepare_params(torch_params, num_heads):
    """One-time conversion from PyTorch (out, in) layout to kernel layout.

    Builds the fused (4, C, C) qkv stack with sqrt(softmax scale) folded into
    the q/k halves (parts 0 and 2) and the stacked, pre-transposed output
    projection weights -- nothing is transposed or scaled per forward pass.
    """
    C = torch_params["w_proj_x"].shape[0]
    hd = C // num_heads
    root_scale = (hd ** -0.5) ** 0.5
    w_x = torch_params["w_qkv_x"]        # (2C, C)
    w_y = torch_params["w_qkv_y"]        # (2C, C)
    w_qkv4 = jnp.stack([
        w_x[:C, :].T * root_scale,   # part 0: q/k of qkv_x (scale folded)
        w_x[C:, :].T,                # part 1: v   of qkv_x
        w_y[:C, :].T * root_scale,   # part 2: q/k of qkv_y (scale folded)
        w_y[C:, :].T,                # part 3: v   of qkv_y
    ], axis=0)                        # (4, C, C), (in, out) per part
    w_proj = jnp.stack([torch_params["w_proj_x"].T,
                        torch_params["w_proj_y"].T], axis=0)       # (2, C, C)
    b_proj = jnp.stack([torch_params["b_proj_x"].reshape(1, C),
                        torch_params["b_proj_y"].reshape(1, C)], axis=0)
    return dict(w_qkv4=w_qkv4, w_proj=w_proj, b_proj=b_proj)


# ---------------------------------------------------------------------------
# Pure-JAX reference (mirrors the PyTorch forward) for a correctness check
# ---------------------------------------------------------------------------
def reference_forward(params, x, y, num_heads):
    B, Nx, C = x.shape
    hd = C // num_heads
    scale = hd ** -0.5

    def attn(q, k, v):
        a = jax.nn.softmax(jnp.einsum("bhnd,bhmd->bhnm", q, k) * scale, axis=-1)
        o = jnp.einsum("bhnm,bhmd->bhnd", a, v)
        return o.transpose(0, 2, 1, 3).reshape(B, Nx, C)

    qkv_x = (x @ params["w_qkv_x"].T).reshape(
        B, Nx, 2, num_heads, hd).transpose(2, 0, 3, 1, 4)
    qkv_y = (x @ params["w_qkv_y"].T).reshape(
        B, Nx, 2, num_heads, hd).transpose(2, 0, 3, 1, 4)
    qx, kx, vx = qkv_x[0], qkv_x[0], qkv_x[1]
    qy, ky, vy = qkv_y[0], qkv_y[0], qkv_y[1]
    xo = attn(qx, ky, vy) @ params["w_proj_x"].T + params["b_proj_x"]
    yo = attn(qy, kx, vx) @ params["w_proj_y"].T + params["b_proj_y"]
    return xo, yo


if __name__ == "__main__":
    B, N, C, H = 2, 8, 32, 4
    key = jax.random.PRNGKey(0)
    kx, ky, kp = jax.random.split(key, 3)
    x = jax.random.normal(kx, (B, N, C), jnp.float32)
    y = jax.random.normal(ky, (B, N, C), jnp.float32)

    torch_params = init_params(kp, C)             # PyTorch (out, in) layout
    params = prepare_params(torch_params, num_heads=H)   # kernel layout, once

    fwd = jax.jit(functools.partial(cross_attention_forward, num_heads=H))
    x_out, y_out = fwd(params, x, y)
    jax.block_until_ready((x_out, y_out))

    x_ref, y_ref = reference_forward(torch_params, x, y, H)
    assert jnp.allclose(x_out, x_ref, atol=2e-3, rtol=2e-3), float(
        jnp.max(jnp.abs(x_out - x_ref)))
    assert jnp.allclose(y_out, y_ref, atol=2e-3, rtol=2e-3), float(
        jnp.max(jnp.abs(y_out - y_ref)))

    print("KERNEL_OK")
</pallas_src>

<mosaic_0001>
module attributes {stable_mosaic.version = 11 : i64} {
  func.func @_matmul_bias_kernel(%arg0: i32, %arg1: i32, %arg2: i32, %arg3: i32, %arg4: memref<1x16x32xf32, #tpu.memory_space<vmem>>, %arg5: memref<1x32x32xf32, #tpu.memory_space<vmem>>, %arg6: memref<1x1x32xf32, #tpu.memory_space<vmem>>, %arg7: memref<1x16x32xf32, #tpu.memory_space<vmem>>, %arg8: memref<16x32xf32, #tpu.memory_space<vmem>>) attributes {dimension_semantics = [#tpu.dimension_semantics<parallel>, #tpu.dimension_semantics<parallel>, #tpu.dimension_semantics<parallel>, #tpu.dimension_semantics<arbitrary>], iteration_bounds = array<i64: 2, 1, 1, 1>, scalar_prefetch = 0 : i64, scratch_operands = 1 : i64, tpu.core_type = #tpu.core_type<tc>, window_params = [{transform_indices = @transform_0, window_bounds = array<i64: 1, 16, 32>}, {transform_indices = @transform_1, window_bounds = array<i64: 1, 32, 32>}, {transform_indices = @transform_2, window_bounds = array<i64: 1, 1, 32>}, {transform_indices = @transform_3, window_bounds = array<i64: 1, 16, 32>}]} {
    %c0_i32 = arith.constant 0 : i32
    %0 = arith.cmpi eq, %arg3, %c0_i32 : i32
    %1 = arith.extui %0 : i1 to i32
    %c0_i32_0 = arith.constant 0 : i32
    %2 = arith.cmpi ne, %1, %c0_i32_0 : i32
    scf.if %2 {
      %cst_12 = arith.constant 0.000000e+00 : f32
      %14 = vector.broadcast %cst_12 : f32 to vector<16x32xf32>
      %c0_13 = arith.constant 0 : index
      %c0_14 = arith.constant 0 : index
      %15 = vector.load %arg8[%c0_13, %c0_14] : memref<16x32xf32, #tpu.memory_space<vmem>>, vector<16x32xf32>
      tpu.vector_store %arg8[%c0_13, %c0_14], %14 {strides = array<i32>} : memref<16x32xf32, #tpu.memory_space<vmem>>, vector<16x32xf32>,
    } else {
    }
    %c0 = arith.constant 0 : index
    %c0_1 = arith.constant 0 : index
    %3 = vector.load %arg8[%c0, %c0_1] : memref<16x32xf32, #tpu.memory_space<vmem>>, vector<16x32xf32>
    %c0_2 = arith.constant 0 : index
    %c0_3 = arith.constant 0 : index
    %c0_4 = arith.constant 0 : index
    %4 = vector.load %arg4[%c0_2, %c0_3, %c0_4] : memref<1x16x32xf32, #tpu.memory_space<vmem>>, vector<1x16x32xf32>
    %5 = vector.shape_cast %4 : vector<1x16x32xf32> to vector<16x32xf32>
    %c0_5 = arith.constant 0 : index
    %c0_6 = arith.constant 0 : index
    %c0_7 = arith.constant 0 : index
    %6 = vector.load %arg5[%c0_5, %c0_6, %c0_7] : memref<1x32x32xf32, #tpu.memory_space<vmem>>, vector<1x32x32xf32>
    %7 = vector.shape_cast %6 : vector<1x32x32xf32> to vector<32x32xf32>
    %cst = arith.constant dense<0.000000e+00> : vector<16x32xf32>
    %8 = tpu.matmul %5, %7, %cst {dimension_numbers = #tpu.dot_dimension_numbers<[1], [0], [0], [1], [0, 0, 1, 1], [], []>} : vector<16x32xf32>, vector<32x32xf32>, vector<16x32xf32> -> vector<16x32xf32>
    %9 = arith.addf %3, %8 : vector<16x32xf32>
    %c0_8 = arith.constant 0 : index
    %c0_9 = arith.constant 0 : index
    %10 = vector.load %arg8[%c0_8, %c0_9] : memref<16x32xf32, #tpu.memory_space<vmem>>, vector<16x32xf32>
    tpu.vector_store %arg8[%c0_8, %c0_9], %9 {strides = array<i32>} : memref<16x32xf32, #tpu.memory_space<vmem>>, vector<16x32xf32>,
    %c0_i32_10 = arith.constant 0 : i32
    %11 = arith.cmpi eq, %arg3, %c0_i32_10 : i32
    %12 = arith.extui %11 : i1 to i32
    %c0_i32_11 = arith.constant 0 : i32
    %13 = arith.cmpi ne, %12, %c0_i32_11 : i32
    scf.if %13 {
      %c0_12 = arith.constant 0 : index
      %c0_13 = arith.constant 0 : index
      %14 = vector.load %arg8[%c0_12, %c0_13] : memref<16x32xf32, #tpu.memory_space<vmem>>, vector<16x32xf32>
      %c0_14 = arith.constant 0 : index
      %c0_15 = arith.constant 0 : index
      %c0_16 = arith.constant 0 : index
      %15 = vector.load %arg6[%c0_14, %c0_15, %c0_16] : memref<1x1x32xf32, #tpu.memory_space<vmem>>, vector<1x1x32xf32>
      %16 = vector.shape_cast %15 : vector<1x1x32xf32> to vector<1x32xf32>
      %17 = vector.broadcast %16 : vector<1x32xf32> to vector<16x32xf32>
      %18 = arith.addf %14, %17 : vector<16x32xf32>
      %c0_17 = arith.constant 0 : index
      %c0_18 = arith.constant 0 : index
      %c0_19 = arith.constant 0 : index
      %19 = vector.load %arg7[%c0_17, %c0_18, %c0_19] : memref<1x16x32xf32, #tpu.memory_space<vmem>>, vector<1x16x32xf32>
      %20 = vector.shape_cast %19 : vector<1x16x32xf32> to vector<16x32xf32>
      %21 = vector.shape_cast %18 : vector<16x32xf32> to vector<1x16x32xf32>
      tpu.vector_store %arg7[%c0_17, %c0_18, %c0_19], %21 {strides = array<i32>} : memref<1x16x32xf32, #tpu.memory_space<vmem>>, vector<1x16x32xf32>,
    } else {
    }
    return
  }
  func.func @transform_0(%arg0: i32, %arg1: i32, %arg2: i32, %arg3: i32) -> (i32, i32, i32) {
    %c0_i32 = arith.constant 0 : i32
    return %arg0, %arg1, %arg3 : i32, i32, i32
  }
  func.func @transform_1(%arg0: i32, %arg1: i32, %arg2: i32, %arg3: i32) -> (i32, i32, i32) {
    %c0_i32 = arith.constant 0 : i32
    return %arg0, %arg3, %arg2 : i32, i32, i32
  }
  func.func @transform_2(%arg0: i32, %arg1: i32, %arg2: i32, %arg3: i32) -> (i32, i32, i32) {
    %c0_i32 = arith.constant 0 : i32
    %c0_i32_0 = arith.constant 0 : i32
    return %arg0, %c0_i32, %arg2 : i32, i32, i32
  }
  func.func @transform_3(%arg0: i32, %arg1: i32, %arg2: i32, %arg3: i32) -> (i32, i32, i32) {
    %c0_i32 = arith.constant 0 : i32
    return %arg0, %arg1, %arg2 : i32, i32, i32
  }
}

module attributes {stable_mosaic.version = 11 : i64} {
  func.func @_flash_attn_kernel(%arg0: i32, %arg1: i32, %arg2: i32, %arg3: i32, %arg4: memref<1x1x8x32xf32, #tpu.memory_space<vmem>>, %arg5: memref<1x1x8x32xf32, #tpu.memory_space<vmem>>, %arg6: memref<1x1x8x32xf32, #tpu.memory_space<vmem>>, %arg7: memref<1x1x8x32xf32, #tpu.memory_space<vmem>>, %arg8: memref<4x8x8xf32, #tpu.memory_space<vmem>>, %arg9: memref<4x8x1xf32, #tpu.memory_space<vmem>>, %arg10: memref<4x8x1xf32, #tpu.memory_space<vmem>>, %arg11: memref<4x8x8xf32, #tpu.memory_space<vmem>>) attributes {dimension_semantics = [#tpu.dimension_semantics<parallel>, #tpu.dimension_semantics<parallel>, #tpu.dimension_semantics<parallel>, #tpu.dimension_semantics<arbitrary>], iteration_bounds = array<i64: 2, 2, 1, 1>, scalar_prefetch = 0 : i64, scratch_operands = 4 : i64, tpu.core_type = #tpu.core_type<tc>, window_params = [{transform_indices = @transform_0, window_bounds = array<i64: 1, 1, 8, 32>}, {transform_indices = @transform_1, window_bounds = array<i64: 1, 1, 8, 32>}, {transform_indices = @transform_2, window_bounds = array<i64: 1, 1, 8, 32>}, {transform_indices = @transform_3, window_bounds = array<i64: 1, 1, 8, 32>}]} {
    %c0_i32 = arith.constant 0 : i32
    %0 = arith.cmpi eq, %arg3, %c0_i32 : i32
    %1 = arith.extui %0 : i1 to i32
    %c0_i32_0 = arith.constant 0 : i32
    %2 = arith.cmpi ne, %1, %c0_i32_0 : i32
    scf.if %2 {
      %cst_34 = arith.constant 0xFF800000 : f32
      %52 = vector.broadcast %cst_34 : f32 to vector<4x8x1xf32>
      %c0_35 = arith.constant 0 : index
      %c0_36 = arith.constant 0 : index
      %c0_37 = arith.constant 0 : index
      %53 = vector.load %arg9[%c0_35, %c0_36, %c0_37] : memref<4x8x1xf32, #tpu.memory_space<vmem>>, vector<4x8x1xf32>
      tpu.vector_store %arg9[%c0_35, %c0_36, %c0_37], %52 {strides = array<i32>} : memref<4x8x1xf32, #tpu.memory_space<vmem>>, vector<4x8x1xf32>,
      %cst_38 = arith.constant 0.000000e+00 : f32
      %54 = vector.broadcast %cst_38 : f32 to vector<4x8x1xf32>
      %c0_39 = arith.constant 0 : index
      %c0_40 = arith.constant 0 : index
      %c0_41 = arith.constant 0 : index
      %55 = vector.load %arg10[%c0_39, %c0_40, %c0_41] : memref<4x8x1xf32, #tpu.memory_space<vmem>>, vector<4x8x1xf32>
      tpu.vector_store %arg10[%c0_39, %c0_40, %c0_41], %54 {strides = array<i32>} : memref<4x8x1xf32, #tpu.memory_space<vmem>>, vector<4x8x1xf32>,
      %cst_42 = arith.constant 0.000000e+00 : f32
      %56 = vector.broadcast %cst_42 : f32 to vector<4x8x8xf32>
      %c0_43 = arith.constant 0 : index
      %c0_44 = arith.constant 0 : index
      %c0_45 = arith.constant 0 : index
      %57 = vector.load %arg11[%c0_43, %c0_44, %c0_45] : memref<4x8x8xf32, #tpu.memory_space<vmem>>, vector<4x8x8xf32>
      tpu.vector_store %arg11[%c0_43, %c0_44, %c0_45], %56 {strides = array<i32>} : memref<4x8x8xf32, #tpu.memory_space<vmem>>, vector<4x8x8xf32>,
      %c0_46 = arith.constant 0 : index
      %c0_47 = arith.constant 0 : index
      %c0_48 = arith.constant 0 : index
      %c0_49 = arith.constant 0 : index
      %58 = vector.load %arg4[%c0_46, %c0_47, %c0_48, %c0_49] : memref<1x1x8x32xf32, #tpu.memory_space<vmem>>, vector<1x1x8x32xf32>
      %59 = vector.shape_cast %58 : vector<1x1x8x32xf32> to vector<8x32xf32>
      %60 = vector.extract_strided_slice %59 {offsets = [0, 0], sizes = [8, 8], strides = [1, 1]} : vector<8x32xf32> to vector<8x8xf32>
      %61 = vector.extract_strided_slice %59 {offsets = [0, 8], sizes = [8, 8], strides = [1, 1]} : vector<8x32xf32> to vector<8x8xf32>
      %62 = vector.extract_strided_slice %59 {offsets = [0, 16], sizes = [8, 8], strides = [1, 1]} : vector<8x32xf32> to vector<8x8xf32>
      %63 = vector.extract_strided_slice %59 {offsets = [0, 24], sizes = [8, 8], strides = [1, 1]} : vector<8x32xf32> to vector<8x8xf32>
      %64 = vector.shape_cast %60 : vector<8x8xf32> to vector<1x8x8xf32>
      %65 = vector.shape_cast %61 : vector<8x8xf32> to vector<1x8x8xf32>
      %66 = vector.shape_cast %62 : vector<8x8xf32> to vector<1x8x8xf32>
      %67 = vector.shape_cast %63 : vector<8x8xf32> to vector<1x8x8xf32>
      %68 = tpu.concatenate %64, %65, %66, %67 in 0 : vector<1x8x8xf32>, vector<1x8x8xf32>, vector<1x8x8xf32>, vector<1x8x8xf32> -> vector<4x8x8xf32>
      %c0_50 = arith.constant 0 : index
      %c0_51 = arith.constant 0 : index
      %c0_52 = arith.constant 0 : index
      %69 = vector.load %arg8[%c0_50, %c0_51, %c0_52] : memref<4x8x8xf32, #tpu.memory_space<vmem>>, vector<4x8x8xf32>
      tpu.vector_store %arg8[%c0_50, %c0_51, %c0_52], %68 {strides = array<i32>} : memref<4x8x8xf32, #tpu.memory_space<vmem>>, vector<4x8x8xf32>,
    } else {
    }
    %c0 = arith.constant 0 : index
    %c0_1 = arith.constant 0 : index
    %c0_2 = arith.constant 0 : index
    %c0_3 = arith.constant 0 : index
    %3 = vector.load %arg5[%c0, %c0_1, %c0_2, %c0_3] : memref<1x1x8x32xf32, #tpu.memory_space<vmem>>, vector<1x1x8x32xf32>
    %4 = vector.shape_cast %3 : vector<1x1x8x32xf32> to vector<8x32xf32>
    %5 = vector.extract_strided_slice %4 {offsets = [0, 0], sizes = [8, 8], strides = [1, 1]} : vector<8x32xf32> to vector<8x8xf32>
    %6 = vector.extract_strided_slice %4 {offsets = [0, 8], sizes = [8, 8], strides = [1, 1]} : vector<8x32xf32> to vector<8x8xf32>
    %7 = vector.extract_strided_slice %4 {offsets = [0, 16], sizes = [8, 8], strides = [1, 1]} : vector<8x32xf32> to vector<8x8xf32>
    %8 = vector.extract_strided_slice %4 {offsets = [0, 24], sizes = [8, 8], strides = [1, 1]} : vector<8x32xf32> to vector<8x8xf32>
    %9 = vector.shape_cast %5 : vector<8x8xf32> to vector<1x8x8xf32>
    %10 = vector.shape_cast %6 : vector<8x8xf32> to vector<1x8x8xf32>
    %11 = vector.shape_cast %7 : vector<8x8xf32> to vector<1x8x8xf32>
    %12 = vector.shape_cast %8 : vector<8x8xf32> to vector<1x8x8xf32>
    %13 = tpu.concatenate %9, %10, %11, %12 in 0 : vector<1x8x8xf32>, vector<1x8x8xf32>, vector<1x8x8xf32>, vector<1x8x8xf32> -> vector<4x8x8xf32>
    %c0_4 = arith.constant 0 : index
    %c0_5 = arith.constant 0 : index
    %c0_6 = arith.constant 0 : index
    %c0_7 = arith.constant 0 : index
    %14 = vector.load %arg6[%c0_4, %c0_5, %c0_6, %c0_7] : memref<1x1x8x32xf32, #tpu.memory_space<vmem>>, vector<1x1x8x32xf32>
    %15 = vector.shape_cast %14 : vector<1x1x8x32xf32> to vector<8x32xf32>
    %16 = vector.extract_strided_slice %15 {offsets = [0, 0], sizes = [8, 8], strides = [1, 1]} : vector<8x32xf32> to vector<8x8xf32>
    %17 = vector.extract_strided_slice %15 {offsets = [0, 8], sizes = [8, 8], strides = [1, 1]} : vector<8x32xf32> to vector<8x8xf32>
    %18 = vector.extract_strided_slice %15 {offsets = [0, 16], sizes = [8, 8], strides = [1, 1]} : vector<8x32xf32> to vector<8x8xf32>
    %19 = vector.extract_strided_slice %15 {offsets = [0, 24], sizes = [8, 8], strides = [1, 1]} : vector<8x32xf32> to vector<8x8xf32>
    %20 = vector.shape_cast %16 : vector<8x8xf32> to vector<1x8x8xf32>
    %21 = vector.shape_cast %17 : vector<8x8xf32> to vector<1x8x8xf32>
    %22 = vector.shape_cast %18 : vector<8x8xf32> to vector<1x8x8xf32>
    %23 = vector.shape_cast %19 : vector<8x8xf32> to vector<1x8x8xf32>
    %24 = tpu.concatenate %20, %21, %22, %23 in 0 : vector<1x8x8xf32>, vector<1x8x8xf32>, vector<1x8x8xf32>, vector<1x8x8xf32> -> vector<4x8x8xf32>
    %c0_8 = arith.constant 0 : index
    %c0_9 = arith.constant 0 : index
    %c0_10 = arith.constant 0 : index
    %25 = vector.load %arg8[%c0_8, %c0_9, %c0_10] : memref<4x8x8xf32, #tpu.memory_space<vmem>>, vector<4x8x8xf32>
    %cst = arith.constant dense<0.000000e+00> : vector<4x8x8xf32>
    %26 = tpu.matmul %25, %13, %cst {dimension_numbers = #tpu.dot_dimension_numbers<[2], [2], [1], [1], [0, 0, 0, 1, 1, 1], [0], [0]>} : vector<4x8x8xf32>, vector<4x8x8xf32>, vector<4x8x8xf32> -> vector<4x8x8xf32>
    %c0_11 = arith.constant 0 : index
    %c0_12 = arith.constant 0 : index
    %c0_13 = arith.constant 0 : index
    %27 = vector.load %arg9[%c0_11, %c0_12, %c0_13] : memref<4x8x1xf32, #tpu.memory_space<vmem>>, vector<4x8x1xf32>
    %cst_14 = arith.constant dense<0xFF800000> : vector<4x8xf32>
    %28 = vector.multi_reduction <maximumf>, %26, %cst_14 [2] : vector<4x8x8xf32> to vector<4x8xf32>
    %29 = vector.shape_cast %28 : vector<4x8xf32> to vector<4x8x1xf32>
    %30 = arith.maximumf %27, %29 : vector<4x8x1xf32>
    %31 = arith.subf %27, %30 : vector<4x8x1xf32>
    %32 = math.exp %31 : vector<4x8x1xf32>
    %33 = vector.broadcast %30 : vector<4x8x1xf32> to vector<4x8x8xf32>
    %34 = arith.subf %26, %33 : vector<4x8x8xf32>
    %35 = math.exp %34 : vector<4x8x8xf32>
    %c0_15 = arith.constant 0 : index
    %c0_16 = arith.constant 0 : index
    %c0_17 = arith.constant 0 : index
    %36 = vector.load %arg10[%c0_15, %c0_16, %c0_17] : memref<4x8x1xf32, #tpu.memory_space<vmem>>, vector<4x8x1xf32>
    %37 = arith.mulf %32, %36 : vector<4x8x1xf32>
    %cst_18 = arith.constant dense<0.000000e+00> : vector<4x8xf32>
    %38 = vector.multi_reduction <add>, %35, %cst_18 [2] : vector<4x8x8xf32> to vector<4x8xf32>
    %39 = vector.shape_cast %38 : vector<4x8xf32> to vector<4x8x1xf32>
    %40 = arith.addf %37, %39 : vector<4x8x1xf32>
    %c0_19 = arith.constant 0 : index
    %c0_20 = arith.constant 0 : index
    %c0_21 = arith.constant 0 : index
    %41 = vector.load %arg10[%c0_19, %c0_20, %c0_21] : memref<4x8x1xf32, #tpu.memory_space<vmem>>, vector<4x8x1xf32>
    tpu.vector_store %arg10[%c0_19, %c0_20, %c0_21], %40 {strides = array<i32>} : memref<4x8x1xf32, #tpu.memory_space<vmem>>, vector<4x8x1xf32>,
    %cst_22 = arith.constant dense<0.000000e+00> : vector<4x8x8xf32>
    %42 = tpu.matmul %35, %24, %cst_22 {dimension_numbers = #tpu.dot_dimension_numbers<[2], [1], [1], [2], [0, 0, 0, 1, 1, 2], [0], [0]>} : vector<4x8x8xf32>, vector<4x8x8xf32>, vector<4x8x8xf32> -> vector<4x8x8xf32>
    %c0_23 = arith.constant 0 : index
    %c0_24 = arith.constant 0 : index
    %c0_25 = arith.constant 0 : index
    %43 = vector.load %arg11[%c0_23, %c0_24, %c0_25] : memref<4x8x8xf32, #tpu.memory_space<vmem>>, vector<4x8x8xf32>
    %44 = vector.broadcast %32 : vector<4x8x1xf32> to vector<4x8x8xf32>
    %45 = arith.mulf %44, %43 : vector<4x8x8xf32>
    %46 = arith.addf %45, %42 : vector<4x8x8xf32>
    %c0_26 = arith.constant 0 : index
    %c0_27 = arith.constant 0 : index
    %c0_28 = arith.constant 0 : index
    %47 = vector.load %arg11[%c0_26, %c0_27, %c0_28] : memref<4x8x8xf32, #tpu.memory_space<vmem>>, vector<4x8x8xf32>
    tpu.vector_store %arg11[%c0_26, %c0_27, %c0_28], %46 {strides = array<i32>} : memref<4x8x8xf32, #tpu.memory_space<vmem>>, vector<4x8x8xf32>,
    %c0_29 = arith.constant 0 : index
    %c0_30 = arith.constant 0 : index
    %c0_31 = arith.constant 0 : index
    %48 = vector.load %arg9[%c0_29, %c0_30, %c0_31] : memref<4x8x1xf32, #tpu.memory_space<vmem>>, vector<4x8x1xf32>
    tpu.vector_store %arg9[%c0_29, %c0_30, %c0_31], %30 {strides = array<i32>} : memref<4x8x1xf32, #tpu.memory_space<vmem>>, vector<4x8x1xf32>,
    %c0_i32_32 = arith.constant 0 : i32
    %49 = arith.cmpi eq, %arg3, %c0_i32_32 : i32
    %50 = arith.extui %49 : i1 to i32
    %c0_i32_33 = arith.constant 0 : i32
    %51 = arith.cmpi ne, %50, %c0_i32_33 : i32
    scf.if %51 {
      %c0_34 = arith.constant 0 : index
      %c0_35 = arith.constant 0 : index
      %c0_36 = arith.constant 0 : index
      %52 = vector.load %arg11[%c0_34, %c0_35, %c0_36] : memref<4x8x8xf32, #tpu.memory_space<vmem>>, vector<4x8x8xf32>
      %c0_37 = arith.constant 0 : index
      %c0_38 = arith.constant 0 : index
      %c0_39 = arith.constant 0 : index
      %53 = vector.load %arg10[%c0_37, %c0_38, %c0_39] : memref<4x8x1xf32, #tpu.memory_space<vmem>>, vector<4x8x1xf32>
      %54 = vector.broadcast %53 : vector<4x8x1xf32> to vector<4x8x8xf32>
      %55 = arith.divf %52, %54 : vector<4x8x8xf32>
      %56 = vector.extract_strided_slice %55 {offsets = [0, 0, 0], sizes = [1, 8, 8], strides = [1, 1, 1]} : vector<4x8x8xf32> to vector<1x8x8xf32>
      %57 = vector.shape_cast %56 : vector<1x8x8xf32> to vector<8x8xf32>
      %58 = vector.extract_strided_slice %55 {offsets = [1, 0, 0], sizes = [1, 8, 8], strides = [1, 1, 1]} : vector<4x8x8xf32> to vector<1x8x8xf32>
      %59 = vector.shape_cast %58 : vector<1x8x8xf32> to vector<8x8xf32>
      %60 = vector.extract_strided_slice %55 {offsets = [2, 0, 0], sizes = [1, 8, 8], strides = [1, 1, 1]} : vector<4x8x8xf32> to vector<1x8x8xf32>
      %61 = vector.shape_cast %60 : vector<1x8x8xf32> to vector<8x8xf32>
      %62 = vector.extract_strided_slice %55 {offsets = [3, 0, 0], sizes = [1, 8, 8], strides = [1, 1, 1]} : vector<4x8x8xf32> to vector<1x8x8xf32>
      %63 = vector.shape_cast %62 : vector<1x8x8xf32> to vector<8x8xf32>
      %64 = tpu.concatenate %57, %59, %61, %63 in 1 : vector<8x8xf32>, vector<8x8xf32>, vector<8x8xf32>, vector<8x8xf32> -> vector<8x32xf32>
      %c0_40 = arith.constant 0 : index
      %c0_41 = arith.constant 0 : index
      %c0_42 = arith.constant 0 : index
      %c0_43 = arith.constant 0 : index
      %65 = vector.load %arg7[%c0_40, %c0_41, %c0_42, %c0_43] : memref<1x1x8x32xf32, #tpu.memory_space<vmem>>, vector<1x1x8x32xf32>
      %66 = vector.shape_cast %65 : vector<1x1x8x32xf32> to vector<8x32xf32>
      %67 = vector.shape_cast %64 : vector<8x32xf32> to vector<1x1x8x32xf32>
      tpu.vector_store %arg7[%c0_40, %c0_41, %c0_42, %c0_43], %67 {strides = array<i32>} : memref<1x1x8x32xf32, #tpu.memory_space<vmem>>, vector<1x1x8x32xf32>,
    } else {
    }
    return
  }
  func.func @transform_0(%arg0: i32, %arg1: i32, %arg2: i32, %arg3: i32) -> (i32, i32, i32, i32) {
    %c2_i32 = arith.constant 2 : i32
    %0 = arith.muli %c2_i32, %arg0 : i32
    %c0_i32 = arith.constant 0 : i32
    %c0_i32_0 = arith.constant 0 : i32
    return %0, %arg1, %arg2, %c0_i32 : i32, i32, i32, i32
  }
  func.func @transform_1(%arg0: i32, %arg1: i32, %arg2: i32, %arg3: i32) -> (i32, i32, i32, i32) {
    %c2_i32 = arith.constant 2 : i32
    %0 = arith.muli %c2_i32, %arg0 : i32
    %c2_i32_0 = arith.constant 2 : i32
    %1 = arith.subi %c2_i32_0, %0 : i32
    %c0_i32 = arith.constant 0 : i32
    %c0_i32_1 = arith.constant 0 : i32
    return %1, %arg1, %arg3, %c0_i32 : i32, i32, i32, i32
  }
  func.func @transform_2(%arg0: i32, %arg1: i32, %arg2: i32, %arg3: i32) -> (i32, i32, i32, i32) {
    %c2_i32 = arith.constant 2 : i32
    %0 = arith.muli %c2_i32, %arg0 : i32
    %c3_i32 = arith.constant 3 : i32
    %1 = arith.subi %c3_i32, %0 : i32
    %c0_i32 = arith.constant 0 : i32
    %c0_i32_0 = arith.constant 0 : i32
    return %1, %arg1, %arg3, %c0_i32 : i32, i32, i32, i32
  }
  func.func @transform_3(%arg0: i32, %arg1: i32, %arg2: i32, %arg3: i32) -> (i32, i32, i32, i32) {
    %c0_i32 = arith.constant 0 : i32
    %c0_i32_0 = arith.constant 0 : i32
    return %arg0, %arg1, %arg2, %c0_i32 : i32, i32, i32, i32
  }
}

module attributes {stable_mosaic.version = 11 : i64} {
  func.func @_matmul_kernel(%arg0: i32, %arg1: i32, %arg2: i32, %arg3: i32, %arg4: memref<16x32xf32, #tpu.memory_space<vmem>>, %arg5: memref<1x32x32xf32, #tpu.memory_space<vmem>>, %arg6: memref<1x16x32xf32, #tpu.memory_space<vmem>>, %arg7: memref<16x32xf32, #tpu.memory_space<vmem>>) attributes {dimension_semantics = [#tpu.dimension_semantics<parallel>, #tpu.dimension_semantics<parallel>, #tpu.dimension_semantics<parallel>, #tpu.dimension_semantics<arbitrary>], iteration_bounds = array<i64: 4, 1, 1, 1>, scalar_prefetch = 0 : i64, scratch_operands = 1 : i64, tpu.core_type = #tpu.core_type<tc>, window_params = [{transform_indices = @transform_0, window_bounds = array<i64: 16, 32>}, {transform_indices = @transform_1, window_bounds = array<i64: 1, 32, 32>}, {transform_indices = @transform_2, window_bounds = array<i64: 1, 16, 32>}]} {
    %c0_i32 = arith.constant 0 : i32
    %0 = arith.cmpi eq, %arg3, %c0_i32 : i32
    %1 = arith.extui %0 : i1 to i32
    %c0_i32_0 = arith.constant 0 : i32
    %2 = arith.cmpi ne, %1, %c0_i32_0 : i32
    scf.if %2 {
      %cst_11 = arith.constant 0.000000e+00 : f32
      %13 = vector.broadcast %cst_11 : f32 to vector<16x32xf32>
      %c0_12 = arith.constant 0 : index
      %c0_13 = arith.constant 0 : index
      %14 = vector.load %arg7[%c0_12, %c0_13] : memref<16x32xf32, #tpu.memory_space<vmem>>, vector<16x32xf32>
      tpu.vector_store %arg7[%c0_12, %c0_13], %13 {strides = array<i32>} : memref<16x32xf32, #tpu.memory_space<vmem>>, vector<16x32xf32>,
    } else {
    }
    %c0 = arith.constant 0 : index
    %c0_1 = arith.constant 0 : index
    %3 = vector.load %arg7[%c0, %c0_1] : memref<16x32xf32, #tpu.memory_space<vmem>>, vector<16x32xf32>
    %c0_2 = arith.constant 0 : index
    %c0_3 = arith.constant 0 : index
    %4 = vector.load %arg4[%c0_2, %c0_3] : memref<16x32xf32, #tpu.memory_space<vmem>>, vector<16x32xf32>
    %c0_4 = arith.constant 0 : index
    %c0_5 = arith.constant 0 : index
    %c0_6 = arith.constant 0 : index
    %5 = vector.load %arg5[%c0_4, %c0_5, %c0_6] : memref<1x32x32xf32, #tpu.memory_space<vmem>>, vector<1x32x32xf32>
    %6 = vector.shape_cast %5 : vector<1x32x32xf32> to vector<32x32xf32>
    %cst = arith.constant dense<0.000000e+00> : vector<16x32xf32>
    %7 = tpu.matmul %4, %6, %cst {dimension_numbers = #tpu.dot_dimension_numbers<[1], [0], [0], [1], [0, 0, 1, 1], [], []>} : vector<16x32xf32>, vector<32x32xf32>, vector<16x32xf32> -> vector<16x32xf32>
    %8 = arith.addf %3, %7 : vector<16x32xf32>
    %c0_7 = arith.constant 0 : index
    %c0_8 = arith.constant 0 : index
    %9 = vector.load %arg7[%c0_7, %c0_8] : memref<16x32xf32, #tpu.memory_space<vmem>>, vector<16x32xf32>
    tpu.vector_store %arg7[%c0_7, %c0_8], %8 {strides = array<i32>} : memref<16x32xf32, #tpu.memory_space<vmem>>, vector<16x32xf32>,
    %c0_i32_9 = arith.constant 0 : i32
    %10 = arith.cmpi eq, %arg3, %c0_i32_9 : i32
    %11 = arith.extui %10 : i1 to i32
    %c0_i32_10 = arith.constant 0 : i32
    %12 = arith.cmpi ne, %11, %c0_i32_10 : i32
    scf.if %12 {
      %c0_11 = arith.constant 0 : index
      %c0_12 = arith.constant 0 : index
      %13 = vector.load %arg7[%c0_11, %c0_12] : memref<16x32xf32, #tpu.memory_space<vmem>>, vector<16x32xf32>
      %c0_13 = arith.constant 0 : index
      %c0_14 = arith.constant 0 : index
      %c0_15 = arith.constant 0 : index
      %14 = vector.load %arg6[%c0_13, %c0_14, %c0_15] : memref<1x16x32xf32, #tpu.memory_space<vmem>>, vector<1x16x32xf32>
      %15 = vector.shape_cast %14 : vector<1x16x32xf32> to vector<16x32xf32>
      %16 = vector.shape_cast %13 : vector<16x32xf32> to vector<1x16x32xf32>
      tpu.vector_store %arg6[%c0_13, %c0_14, %c0_15], %16 {strides = array<i32>} : memref<1x16x32xf32, #tpu.memory_space<vmem>>, vector<1x16x32xf32>,
    } else {
    }
    return
  }
  func.func @transform_0(%arg0: i32, %arg1: i32, %arg2: i32, %arg3: i32) -> (i32, i32) {
    %c0_i32 = arith.constant 0 : i32
    return %arg1, %arg3 : i32, i32
  }
  func.func @transform_1(%arg0: i32, %arg1: i32, %arg2: i32, %arg3: i32) -> (i32, i32, i32) {
    %c0_i32 = arith.constant 0 : i32
    return %arg0, %arg3, %arg2 : i32, i32, i32
  }
  func.func @transform_2(%arg0: i32, %arg1: i32, %arg2: i32, %arg3: i32) -> (i32, i32, i32) {
    %c0_i32 = arith.constant 0 : i32
    return %arg0, %arg1, %arg2 : i32, i32, i32
  }
}

</mosaic_0001>

<bundles_post_ra>
// kernel: cross_attention_forward.3
= control target key start
LH: loop header
LB: loop body
LE: loop exit
PB: predicated region body
PF: predicated region fallthrough
CT: control target
= control target key end

     0   :  { %7 = vsyncpa [#allocation4], 0  ;;  %s899_s0 = inlined_call_operand.hbm [shape: f32[16,32], index: 0, kind: input, shape index: {}]   ;;  %s900_s1 = inlined_call_operand.hbm [shape: f32[4,32,32], index: 1, kind: input, shape index: {}]   ;;  %s901_s2 = inlined_call_operand.vmem [shape: f32[4,16,32], index: 2, kind: output, shape index: {}]  }
   0x1   :  { %8 = vsyncpa [#allocation6], 0 }
   0x2   :  { %10 = vsyncpa [#allocation6 + $0x1], 0  ;;  %s727_s9 = smov 0   ;;  %s729_s10 = smov 0  }
   0x3   :  { %s731_s11 = smov 0   ;;  %s733_s12 = smov 0  }
   0x4   :  { %s735_s13 = smov 0   ;;  %s737_s14 = smov 0  }
   0x5 LB: > { %s480_s15 = sadd.s32 4294967295, %s705_s14   ;;  %p94_p0 = scmp.ne.s32.totalorder %s689_s10, %s685_s9  ;;  %s705_s14 = sphi %s737_s14, %s16_s14   ;;  %s701_s13 = sphi %s735_s13, %s918_s13   ;;  %s697_s12 = sphi %s733_s12, %s917_s12   ;;  %s693_s11 = sphi %s731_s11, %s916_s11   ;;  %s689_s10 = sphi %s729_s10, %s915_s10   ;;  %s685_s9 = sphi %s727_s9, %s914_s9  }
   0x6   : > { %p757_p1 = scmp.eq.s32.totalorder %s480_s15, 0  ;;  %p482_p2 = scmp.ge.s32.totalorder %s705_s14, 1 }
   0x7   : > { %p135_p3 = scmp.lt.s32.totalorder %s705_s14, 5  ;;  %s707_s19 = smov [#allocation3]  }
   0x8   : > { %s906_s16 = scalar_select %p757_p1, 1, 0 }
   0x9   : > { %p765_p4 = por %p757_p1, %p94_p0  ;;  %p769_p5 = pnand %p482_p2, %p135_p3 }
   0xa   : > { %s151_s20 = sshll.u32 %s707_s19, 4  ;;  %s42_s22 = sadd.s32 1, %s701_s13  ;;  %s152_s20 = int_to_ptr.vmem [resolvable:$true] %s151_s20 }
   0xb   : > { %s907_s17 = scalar_select %p765_p4, 1, 0 }
   0xc   : > { %s908_s18 = scalar_select %p769_p5, 1, 0 }
   0xd   : > { %p530_p6 = pneg %p769_p5  ;;  %s593_s25 = scalar_lea.hbm %s899_s0, 256 }
   0xe   : > { %p594_p8 = scmp.ne.s32.totalorder %s899_s0, %s593_s25  ;;  %p600_p12 = scmp.lt.u32.totalorder %s593_s25, %s899_s0 }
   0xf   : > { %p777_p7 = pnand %p530_p6, %p757_p1 }
  0x11   : > { %p595_p9 = pneg %p777_p7 }
  0x13   : > { %p596_p10 = pnand %p595_p9, %p594_p8 }
  0x15   : > { %p597_p11 = pneg %p596_p10 }
  0x17   : > { %p602_p13 = pnand %p600_p12, %p597_p11 }
  0x19   : > { %605 = shalt.err (!%p602_p13)
}
  0x1a   : > { %s606_s30 = scalar_lea.vmem %s152_s20, 256  ;;  %p614_p6 = scmp.lt.s32.totalorder %s152_s20, %s152_s20 }
  0x1b   : > { %p607_p0 = scmp.ne.s32.totalorder %s152_s20, %s606_s30  ;;  %p615_p4 = scmp.lt.s32.totalorder %s606_s30, %s606_s30 }
  0x1d   : > { %p609_p2 = pnand %p607_p0, %p595_p9  ;;  %p616_p1 = por %p615_p4, %p614_p6 }
  0x1f   : > { %p610_p3 = pneg %p609_p2 }
  0x21   : > { %p617_p5 = pnand %p616_p1, %p610_p3 }
  0x23   : > { %620 = shalt.err (!%p617_p5)
}
  0x24   : > { %s708_s3 = smov 128   ;;  %s709_s4 = smov 8  }
  0x25   : > { %533 = dma.hbm_to_vmem [thread:$0]  (!%p777_p7), %s899_s0, 256, %s152_s20, [#allocation4], %s708_s3, %s708_s3, %s709_s4  }
  0x26   : > { %p44_p1 = scmp.ge.s32.totalorder %s42_s22, 4  ;;  %s81_s7 = sadd.s32 1, %s693_s11 }
  0x27   : > { %p88_p4 = scmp.ne.s32.totalorder %s693_s11, %s689_s10  ;;  %p89_p5 = scmp.eq.s32.totalorder %s705_s14, 0 }
  0x28   : > { %s920_s22 = smov (%p44_p1, %s42_s22), 0  ;;  %p539_p9 = scmp.lt.s32.totalorder %s705_s14, 4 }
  0x29   : > { %p90_p8 = por %p89_p5, %p88_p4  ;;  %s74_s8 = ssub.s32 %s701_s13, %s920_s22 }
  0x2a   : > { %s165_s9 = sand.u32 1, %s693_s11   ;;  %p79_p10 = scmp.eq.s32.totalorder %s74_s8, 0 }
  0x2b   : > { %s485_s15 = sshll.u32 %s165_s9, 5  ;;  %s497_s19 = sshll.u32 %s701_s13, 9 }
  0x2c   : > { %s813_s21 = scalar_select %p79_p10, %s693_s11, %s81_s7  }
  0x2d   : > { %s818_s20 = scalar_lea.hbm %s900_s1, %s497_s19  ;;  %s169_s25 = scalar_lea.vmem [#allocation5], %s485_s15 }
  0x2e   : > { %s179_s26 = sshll.u32 %s169_s25, 4  ;;  %p820_p7 = pnand %p539_p9, %p90_p8  ;;  %s824_s26 = int_to_ptr.vmem [resolvable:$true] %s179_s26 }
  0x2f   : > { %s826_s28 = scalar_lea.sflag [#allocation6], %s165_s9  ;;  %s621_s29 = scalar_lea.hbm %s818_s20, 512 }
  0x30   : > { %p622_p11 = scmp.ne.s32.totalorder %s818_s20, %s621_s29  ;;  %p623_p12 = pneg %p820_p7 }
  0x31   : > { %s626_s6 = scalar_lea.hbm %s900_s1, 2048  ;;  %p627_p2 = scmp.lt.u32.totalorder %s818_s20, %s900_s1 }
  0x32   : > { %p624_p13 = pnand %p623_p12, %p622_p11  ;;  %p628_p3 = scmp.lt.u32.totalorder %s626_s6, %s621_s29 }
  0x33   : > { %p630_p1 = scmp.lt.u32.totalorder %s621_s29, %s818_s20 }
  0x34   : > { %p625_p0 = pneg %p624_p13  ;;  %p629_p6 = por %p628_p3, %p627_p2 }
  0x36   : > { %p631_p4 = por %p630_p1, %p629_p6 }
  0x38   : > { %p632_p5 = pnand %p631_p4, %p625_p0 }
  0x3a   : > { %635 = shalt.err (!%p632_p5)
}
  0x3b   : > { %s636_s9 = scalar_lea.vmem %s824_s26, 512  ;;  %s710_s15 = smov [#allocation5]  }
  0x3c   : > { %p637_p8 = scmp.ne.s32.totalorder %s824_s26, %s636_s9  ;;  %s641_s19 = sshll.u32 %s710_s15, 4  ;;  %s642_s19 = int_to_ptr.vmem [resolvable:$false] %s641_s19 }
  0x3d   : > { %s643_s23 = scalar_lea.vmem %s642_s19, 1024  ;;  %p644_p11 = scmp.lt.s32.totalorder %s824_s26, %s642_s19 }
  0x3e   : > { %p639_p9 = pnand %p637_p8, %p623_p12  ;;  %p645_p13 = scmp.lt.s32.totalorder %s643_s23, %s636_s9 }
  0x40   : > { %p640_p10 = pneg %p639_p9  ;;  %p646_p2 = por %p645_p13, %p644_p11 }
  0x42   : > { %p647_p3 = pnand %p646_p2, %p640_p10 }
  0x44   : > { %650 = shalt.err (!%p647_p3)
}
  0x45   : > { %537 = dma.hbm_to_vmem [thread:$0]  (!%p820_p7), %s818_s20, 512, %s824_s26, %s826_s28, %s708_s3, %s708_s3, %s709_s4  }
  0x46   : > { %p911_p12 = scmp.ne.s32.totalorder %s908_s18, 0 }
  0x47   : > { %p912_p0 = scmp.ne.s32.totalorder (!%p911_p12), %s906_s16, 0 }
  0x48   : > { %191 = sbr.rel (%p911_p12) target bundleno = 319 (0x13f), region = 28 }
  0x4f   : > { %676 = dma.done.wait (%p912_p0), [#allocation4], 256  }
  0x50   : > { %678 = vsyncadd (%p912_p0), [#allocation4], 4294967040  ;;  %s197_s24 = sand.u32 1, %s689_s10   ;;  %p913_p6 = scmp.ne.s32.totalorder %s907_s17, 0 }
  0x51   : > { %s490_s25 = sshll.u32 %s197_s24, 5  ;;  %s198_s27 = scalar_lea.sflag [#allocation6], %s197_s24 }
  0x52   : > { %s201_s29 = scalar_lea.vmem [#allocation5], %s490_s25 }
  0x53   : > { %680 = dma.done.wait (%p913_p6), %s198_s27, 512  }
  0x54   : > { %682 = vsyncadd (%p913_p6), %s198_s27, 4294966784  ;;  %vm248_vm0 = vcmask 261120   ;;  %v711_v0 = vmov 0.0   ;;  %v255_v1 = vld [vmem:[%s201_s29] sm:$0xff]  ;;  %v256_v2 = vld [vmem:[%s201_s29 + $0x8] sm:$0xff]  ;;  %p232_p7 = scmp.lt.s32.totalorder %s697_s12, 3 }
  0x55   : > { %250 = vst.msk [vmem:[#allocation2 + $0x8] sm:$0xff] %vm248_vm0, %v711_v0  ;;  %249 = vst.msk [vmem:[#allocation2] sm:$0xff] %vm248_vm0, %v711_v0  ;;  %v257_v3 = vld [vmem:[%s201_s29 + $0x10] sm:$0xff]  ;;  %v516_v4 = vpack.c.bf16 %v256_v2, %v255_v1  ;;  %v258_v5 = vld [vmem:[%s201_s29 + $0x18] sm:$0xff] }
  0x56   : > { %v253_v6 = vld [vmem:[#allocation3] sm:$0xff]  ;;  %v520_v7 = vpack.c.bf16 %v258_v5, %v257_v3  ;;  %v254_v8 = vld [vmem:[#allocation3 + $0x8] sm:$0xff]  ;;  %s922_s12 = smov (!%p232_p7, %s697_s12), 3 }
  0x57   : > { %513 = vmatprep.mubr.msk.f32.mxu0 %vm248_vm0, %v253_v6  ;;  %517 = vmatprep.subr.bf16.mxu0 %v516_v4  ;;  %s498_s16 = sshll.u32 %s922_s12, 4 }
  0x58   : > { %519 = vmatpush3.bf16.msra.mxu0 %v516_v4  ;;  %s242_s3 = scalar_lea.vmem %s901_s2, %s498_s16 }
  0x59   : > { %521 = vmatprep.subr.bf16.mxu0 %v520_v7 }
  0x5c   : > { %523 = vmatpush3.bf16.msra.mxu0 %v520_v7  ;;  %v252_v9 = vld [vmem:[#allocation2 + $0x8] sm:$0xff]  ;;  %v251_v10 = vld [vmem:[#allocation2] sm:$0xff] }
  0x5f   : > { %514 = vmatmul.mubr.msk.f32.vlgmr.msra.gmra.mrb[0].mxu0 %vm248_vm0, %v254_v8 }
 0x132   : > { %v515_v11 = vpop.f32.mrb[0].mxu0 }
 0x133   : > { %v342_v12 = vadd.f32 %v515_v11, %v252_v9  ;;  %v332_v13 = vpop.f32.mrb[1].mxu0 }
 0x134   : > { %v341_v14 = vadd.f32 %v332_v13, %v251_v10 }
 0x135   : > { %344 = vst.msk [vmem:[#allocation2 + $0x8] sm:$0xff] %vm248_vm0, %v342_v12 }
 0x136   : > { %343 = vst.msk [vmem:[#allocation2] sm:$0xff] %vm248_vm0, %v341_v14 }
 0x13c   : > { %v349_v15 = vld [vmem:[#allocation2 + $0x8] sm:$0xff] }
 0x13d   : > { %351 = vst.msk [vmem:[%s242_s3 + $0x8] sm:$0xff] %vm248_vm0, %v349_v15  ;;  %v348_v16 = vld [vmem:[#allocation2] sm:$0xff] }
 0x13e   : > { %350 = vst.msk [vmem:[%s242_s3] sm:$0xff] %vm248_vm0, %v348_v16 }
 0x13f PF: > { %s16_s14 = sadd.s32 1, %s705_s14   ;;  %s914_s9 = smov %s689_s10 }
 0x140   : > { %p13_p1 = scmp.ge.s32.totalorder %s16_s14, 6   ;;  %s915_s10 = smov %s693_s11 }
 0x141   : > { %s916_s11 = smov %s813_s21  ;;  %s917_s12 = smov %s701_s13 }
 0x142   : > { %s918_s13 = smov %s920_s22  ;;  %15 = sbr.rel (!%p13_p1) target bundleno = 5 (0x5), region = 82 }
 0x149   :  { %388 = vsyncpa [#allocation4], 1 }
 0x14a   :  { %390 = vsyncpa [#allocation4 + $0x1], 1 }
 0x14b   :  { %391 = vsyncpa [#allocation6], 1 }
 0x14c   :  { %393 = vsyncpa [#allocation6 + $0x1], 1 }

// kernel: cross_attention_forward.5
= control target key start
LH: loop header
LB: loop body
LE: loop exit
PB: predicated region body
PF: predicated region fallthrough
CT: control target
= control target key end

     0   :  { %s685_s12 = smov 0   ;;  %s687_s13 = smov 0   ;;  %s737_s0 = inlined_call_operand.vmem [shape: f32[2,16,32], index: 0, kind: input, shape index: {}]   ;;  %s738_s1 = inlined_call_operand.vmem [shape: f32[2,32,32], index: 1, kind: input, shape index: {}]   ;;  %s739_s2 = inlined_call_operand.vmem [shape: f32[2,1,32], index: 2, kind: input, shape index: {}]   ;;  %s740_s3 = inlined_call_operand.vmem [shape: f32[2,16,32], index: 3, kind: output, shape index: {}]  }
   0x1   :  { %s689_s14 = smov 0  }
   0x2 LB: > { %s39_s15 = sadd.s32 1, %s658_s13  ;;  %p575_p0 = scmp.ge.s32.totalorder %s662_s14, 1  ;;  %s662_s14 = sphi %s689_s14, %s13_s14   ;;  %s658_s13 = sphi %s687_s13, %s742_s13   ;;  %s654_s12 = sphi %s685_s12, %s741_s12  }
   0x3   : > { %p41_p1 = scmp.ge.s32.totalorder %s39_s15, 2  ;;  %p214_p2 = scmp.lt.s32.totalorder %s662_s14, 3 }
   0x5   : > { %s744_s15 = smov (%p41_p1, %s39_s15), 0  ;;  %p215_p3 = pnand %p575_p0, %p214_p2 }
   0x6   : > { %p271_p4 = scmp.lt.s32.totalorder (!%p215_p3), %s654_s12, 1  ;;  %vm319_vm0 = vcmask (!%p215_p3), 261120   ;;  %v664_v0 = vmov (!%p215_p3), 0.0  }
   0x7   : > { %218 = sbr.rel (%p215_p3) target bundleno = 254 (0xfe), region = 32  ;;  %321 = vst.msk [vmem:[#allocation2 + $0x8] sm:$0xff] (!%p215_p3), %vm319_vm0, %v664_v0  ;;  %320 = vst.msk [vmem:[#allocation2] sm:$0xff] (!%p215_p3), %vm319_vm0, %v664_v0 }
   0xe   : > { %s746_s12 = smov (!%p271_p4, %s654_s12), 1  ;;  %v323_v9 = vld [vmem:[#allocation2 + $0x8] sm:$0xff]  ;;  %v322_v10 = vld [vmem:[#allocation2] sm:$0xff] }
   0xf   : > { %s588_s16 = sshll.u32 %s746_s12, 5  ;;  %s587_s20 = sshll.u32 %s746_s12, 4 }
  0x10   : > { %s294_s19 = scalar_lea.vmem %s738_s1, %s588_s16  ;;  %s281_s23 = scalar_lea.vmem %s737_s0, %s587_s20 }
  0x11   : > { %v326_v1 = vld [vmem:[%s294_s19] sm:$0xff]  ;;  %v327_v2 = vld [vmem:[%s294_s19 + $0x8] sm:$0xff]  ;;  %v328_v3 = vld [vmem:[%s294_s19 + $0x10] sm:$0xff]  ;;  %s301_s26 = scalar_lea.vmem %s739_s2, %s746_s12  ;;  %s313_s29 = scalar_lea.vmem %s740_s3, %s587_s20 }
  0x12   : > { %v607_v4 = vpack.c.bf16 %v327_v2, %v326_v1  ;;  %v329_v5 = vld [vmem:[%s294_s19 + $0x18] sm:$0xff]  ;;  %v324_v6 = vld [vmem:[%s281_s23] sm:$0xff]  ;;  %v325_v8 = vld [vmem:[%s281_s23 + $0x8] sm:$0xff] }
  0x13   : > { %v611_v7 = vpack.c.bf16 %v329_v5, %v328_v3  ;;  %604 = vmatprep.mubr.msk.f32.mxu0 %vm319_vm0, %v324_v6  ;;  %v584_v15 = vld [vmem:[%s301_s26] ss:$0 sm:$0xff] }
  0x14   : > { %608 = vmatprep.subr.bf16.mxu0 %v607_v4 }
  0x15   : > { %610 = vmatpush3.bf16.msra.mxu0 %v607_v4 }
  0x16   : > { %612 = vmatprep.subr.bf16.mxu0 %v611_v7 }
  0x19   : > { %614 = vmatpush3.bf16.msra.mxu0 %v611_v7 }
  0x1c   : > { %605 = vmatmul.mubr.msk.f32.vlgmr.msra.gmra.mrb[0].mxu0 %vm319_vm0, %v325_v8 }
  0xef   : > { %v606_v11 = vpop.f32.mrb[0].mxu0 }
  0xf0   : > { %v413_v12 = vadd.f32 %v606_v11, %v323_v9  ;;  %v403_v13 = vpop.f32.mrb[1].mxu0 }
  0xf1   : > { %v412_v14 = vadd.f32 %v403_v13, %v322_v10 }
  0xf2   : > { %415 = vst.msk [vmem:[#allocation2 + $0x8] sm:$0xff] %vm319_vm0, %v413_v12 }
  0xf3   : > { %414 = vst.msk [vmem:[#allocation2] sm:$0xff] %vm319_vm0, %v412_v14 }
  0xf9   : > { %v420_v16 = vld [vmem:[#allocation2 + $0x8] sm:$0xff] }
  0xfa   : > { %v429_v17 = vadd.f32 %v584_v15, %v420_v16  ;;  %v419_v18 = vld [vmem:[#allocation2] sm:$0xff] }
  0xfb   : > { %v428_v19 = vadd.f32 %v584_v15, %v419_v18 }
  0xfc   : > { %431 = vst.msk [vmem:[%s313_s29 + $0x8] sm:$0xff] %vm319_vm0, %v429_v17 }
  0xfd   : > { %430 = vst.msk [vmem:[%s313_s29] sm:$0xff] %vm319_vm0, %v428_v19 }
  0xfe PF: > { %s13_s14 = sadd.s32 1, %s662_s14   ;;  %s741_s12 = smov %s658_s13 }
  0xff   : > { %p10_p5 = scmp.ge.s32.totalorder %s13_s14, 4   ;;  %s742_s13 = smov %s744_s15 }
 0x101   :  { %12 = sbr.rel (!%p10_p5) target bundleno = 2 (0x2), region = 76 }

// kernel: cross_attention_forward.4
= control target key start
LH: loop header
LB: loop body
LE: loop exit
PB: predicated region body
PF: predicated region fallthrough
CT: control target
= control target key end

     0   :  { %s1579_s12 = smov 0   ;;  %s1581_s13 = smov 0   ;;  %s1758_s0 = inlined_call_operand.vmem [shape: f32[4,2,8,32], index: 0, kind: input, shape index: {}, may-alias: {0,1,2}]   ;;  %s1759_s1 = inlined_call_operand.vmem [shape: f32[4,2,8,32], index: 1, kind: input, shape index: {}, may-alias: {0,1,2}]   ;;  %s1760_s2 = inlined_call_operand.vmem [shape: f32[4,2,8,32], index: 2, kind: input, shape index: {}, may-alias: {0,1,2}]   ;;  %s1761_s3 = inlined_call_operand.vmem [shape: f32[2,2,8,32], index: 3, kind: output, shape index: {}]  }
   0x1   :  { %s1583_s14 = smov 0   ;;  %s1585_s15 = smov 0  }
   0x2   :  { %s1587_s16 = smov 0  }
   0x3 LB: > { %s35_s17 = sadd.s32 1, %s1539_s14  ;;  %s39_s18 = sadd.s32 1, %s1543_s15  ;;  %s1547_s16 = sphi %s1587_s16, %s13_s16   ;;  %s1543_s15 = sphi %s1585_s15, %s1765_s15   ;;  %s1539_s14 = sphi %s1583_s14, %s1764_s14   ;;  %s1535_s13 = sphi %s1581_s13, %s1763_s13   ;;  %s1531_s12 = sphi %s1579_s12, %s1762_s12  }
   0x4   : > { %p37_p0 = scmp.ge.s32.totalorder %s35_s17, 2  ;;  %p1351_p1 = scmp.ge.s32.totalorder %s1547_s16, 1 }
   0x5   : > { %p237_p2 = scmp.lt.s32.totalorder %s1547_s16, 5 }
   0x6   : > { %s1767_s17 = smov (%p37_p0, %s35_s17), 0  ;;  %s1769_s18 = smov (!%p37_p0, %s39_s18), %s1543_s15 }
   0x7   : > { %p238_p3 = pnand %p1351_p1, %p237_p2  ;;  %p41_p4 = scmp.ge.s32.totalorder %s1769_s18, 2 }
   0x8   : > { %s1612_s19 = sshll.u32 (!%p238_p3), %s1535_s13, 1  ;;  %p303_p5 = scmp.lt.s32.totalorder (!%p238_p3), %s1531_s12, 1  ;;  %vm367_vm0 = vcmask (!%p238_p3), 64512   ;;  %v1549_v0 = vmov (!%p238_p3), 0.0   ;;  %vm1550_vm1 = vmmov (!%p238_p3), 0   ;;  %vm358_vm2 = vcmask (!%p238_p3), 7168  }
   0x9   : > { %s1771_s18 = smov (%p41_p4, %s1769_s18), 0  ;;  %241 = sbr.rel (%p238_p3) target bundleno = 1066 (0x42a), region = 32 }
   0xa   : > { %p301_p6 = scmp.lt.s32.totalorder (!%p238_p3), %s1612_s19, 3  ;;  %1393 = vmatprep.subr.mxu0 (!%p238_p3), %v1549_v0  ;;  %368 = vst.msk [vmem:[#allocation5] sm:$0xff] (!%p238_p3), %vm367_vm0, %v1549_v0  ;;  %369 = vst.msk [vmem:[#allocation5 + $0x8] sm:$0xff] (!%p238_p3), %vm367_vm0, %v1549_v0  ;;  %1395 = vmatprep.mubr.msk.f32.mxu0 (!%p238_p3), %vm1550_vm1, %v1549_v0  ;;  %s314_s22 = ssub.s32 (!%p238_p3), 2, %s1612_s19  ;;  %v1554_v13 = vmov (!%p238_p3), -inf   ;;  %v1555_v17 = vmov (!%p238_p3), 0  }
   0xb   : > { %370 = vst.msk [vmem:[#allocation5 + $0x10] sm:$0xff] (!%p238_p3), %vm367_vm0, %v1549_v0  ;;  %371 = vst.msk [vmem:[#allocation5 + $0x18] sm:$0xff] (!%p238_p3), %vm367_vm0, %v1549_v0  ;;  %1398 = vmatprep.subr.mxu1 (!%p238_p3), %v1549_v0  ;;  %1400 = vmatprep.mubr.msk.f32.mxu1 (!%p238_p3), %vm1550_vm1, %v1549_v0  ;;  %p315_p7 = scmp.lt.s32.totalorder (!%p238_p3), %s314_s22, 3  ;;  %s1551_s28 = smov (!%p238_p3), 120   ;;  %vm1188_vm3 = vcmask (!%p238_p3), 130048   ;;  %vm1190_vm4 = vcmask (!%p238_p3), 195584  }
   0xc   : > { %s1552_s29 = smov (!%p238_p3), 104   ;;  %s1553_s6 = smov (!%p238_p3), 112   ;;  %359 = vst.msk [vmem:[#allocation3] sm:$0xff] (!%p238_p3), %vm358_vm2, %v1554_v13  ;;  %360 = vst.msk [vmem:[#allocation3 + $0x8] sm:$0xff] (!%p238_p3), %vm358_vm2, %v1554_v13  ;;  %1483 = vset.pattern.permute.xlu1 (!%p238_p3), %v1555_v17  ;;  %1484 = vset.pattern.permute.xlu0 (!%p238_p3), %v1555_v17  ;;  %vm1192_vm5 = vcmask (!%p238_p3), 261120  }
   0xd   : > { %361 = vst.msk [vmem:[#allocation3 + $0x10] sm:$0xff] (!%p238_p3), %vm358_vm2, %v1554_v13  ;;  %362 = vst.msk [vmem:[#allocation3 + $0x18] sm:$0xff] (!%p238_p3), %vm358_vm2, %v1554_v13  ;;  %s329_s10 = ssub.s32 (!%p238_p3), 3, %s1612_s19  ;;  %s1557_s25 = smov (!%p238_p3), 16  }
   0xe   : > { %363 = vst.msk [vmem:[#allocation4] sm:$0xff] (!%p238_p3), %vm358_vm2, %v1549_v0  ;;  %364 = vst.msk [vmem:[#allocation4 + $0x8] sm:$0xff] (!%p238_p3), %vm358_vm2, %v1549_v0  ;;  %p330_p8 = scmp.lt.s32.totalorder (!%p238_p3), %s329_s10, 3  ;;  %s1558_s26 = smov (!%p238_p3), 24  }
   0xf   : > { %365 = vst.msk [vmem:[#allocation4 + $0x10] sm:$0xff] (!%p238_p3), %vm358_vm2, %v1549_v0  ;;  %366 = vst.msk [vmem:[#allocation4 + $0x18] sm:$0xff] (!%p238_p3), %vm358_vm2, %v1549_v0  ;;  %p343_p9 = scmp.lt.s32.totalorder (!%p238_p3), %s1535_s13, 1 }
  0x10   : > { %s1773_s12 = smov (!%p303_p5, %s1531_s12), 1  ;;  %s1775_s22 = smov (!%p315_p7, %s314_s22), 3 }
  0x11   : > { %s302_s20 = scalar_select %p301_p6, %s1612_s19, 3 }
  0x12   : > { %s1356_s30 = sshll.u32 %s1775_s22, 1  ;;  %s1777_s10 = smov (!%p330_p8, %s329_s10), 3 }
  0x13   : > { %s1353_s21 = sshll.u32 %s302_s20, 1  ;;  %s323_s4 = sadd.s32 %s1356_s30, %s1773_s12  ;;  %v1687_v27 = vld [vmem:[#allocation3] sm:$0xff]  ;;  %v712_v32 = vld [vmem:[#allocation3 + $0x8] sm:$0xff] }
  0x14   : > { %s309_s23 = sadd.s32 %s1353_s21, %s1773_s12  ;;  %s1357_s5 = sshll.u32 %s323_s4, 3  ;;  %v713_v35 = vld [vmem:[#allocation3 + $0x10] sm:$0xff]  ;;  %v714_v39 = vld [vmem:[#allocation3 + $0x18] sm:$0xff] }
  0x15   : > { %s1354_s24 = sshll.u32 %s309_s23, 3  ;;  %s325_s9 = scalar_lea.vmem %s1759_s1, %s1357_s5 }
  0x16   : > { %s311_s27 = scalar_lea.vmem %s1758_s0, %s1354_s24  ;;  %v387_v2 = vld [vmem:[%s325_s9] sm:$0xff]  ;;  %s1359_s11 = sshll.u32 %s1777_s10, 1 }
  0x17   : > { %v372_v1 = vld [vmem:[%s311_s27] sm:$0xff]  ;;  %1394 = vmatpush3.xpose.msk.msra.mxu0 %vm367_vm0, %v387_v2  ;;  %s338_s20 = sadd.s32 %s1359_s11, %s1773_s12  ;;  %s1556_s19 = smov 8  }
  0x18   : > { %374 = vrot.lane.b32.xlu0 %v372_v1, %s1551_s28  ;;  %383 = vst.msk [vmem:[#allocation2] sm:$0xff] %vm367_vm0, %v372_v1  ;;  %380 = vrot.lane.b32.xlu1 %v372_v1, %s1552_s29  ;;  %s1360_s21 = sshll.u32 %s338_s20, 3  ;;  %s1779_s13 = smov (!%p343_p9, %s1535_s13), 1 }
  0x19   : > { %1403 = vmatprep.subr.mxu0 %v1549_v0  ;;  %s340_s24 = scalar_lea.vmem %s1760_s2, %s1360_s21  ;;  %s1361_s27 = sshll.u32 %s1779_s13, 1 }
  0x1a   : > { %v395_v31 = vld [vmem:[%s340_s24] sm:$0xff] }
  0x1c   : > { %377 = vrot.lane.b32.xlu0 %v372_v1, %s1553_s6  ;;  %389 = vrot.lane.b32.xlu1 %v387_v2, %s1551_s28 }
  0x1f   : > { %v406_v3 = vld [vmem:[#allocation2] sm:$0xff] }
  0x20   : > { %391 = vrot.lane.b32.xlu0 %v387_v2, %s1553_s6  ;;  %1396 = vmatmul.mubr.msk.f32.vlgmr.msra.gmra.mrb[0].mxu0 %vm367_vm0, %v406_v3 }
  0x21   : > { %393 = vrot.lane.b32.xlu1 %v387_v2, %s1552_s29  ;;  %1405 = vmatprep.mubr.msk.f32.mxu0 %vm1550_vm1, %v1549_v0 }
  0x8a   : > { %v375_v4 = vpop.permute.xlu0 %374  ;;  %v381_v5 = vpop.permute.xlu1 %380 }
  0x8b   : > { %384 = vst.msk [vmem:[#allocation2 + $0x8] sm:$0xff] %vm367_vm0, %v375_v4  ;;  %386 = vst.msk [vmem:[#allocation2 + $0x18] sm:$0xff] %vm367_vm0, %v381_v5 }
  0x8e   : > { %v378_v6 = vpop.permute.xlu0 %377  ;;  %v390_v7 = vpop.permute.xlu1 %389 }
  0x8f   : > { %385 = vst.msk [vmem:[#allocation2 + $0x10] sm:$0xff] %vm367_vm0, %v378_v6  ;;  %1399 = vmatpush3.xpose.msk.msra.mxu1 %vm367_vm0, %v390_v7 }
  0x90   : > { %1408 = vmatprep.subr.mxu1 %v1549_v0 }
  0x92   : > { %v392_v8 = vpop.permute.xlu0 %391  ;;  %v407_v9 = vld [vmem:[#allocation2 + $0x8] sm:$0xff]  ;;  %v409_v11 = vld [vmem:[#allocation2 + $0x18] sm:$0xff] }
  0x93   : > { %1404 = vmatpush3.xpose.msk.msra.mxu0 %vm367_vm0, %v392_v8  ;;  %v394_v10 = vpop.permute.xlu1 %393  ;;  %1401 = vmatmul.mubr.msk.f32.vlgmr.msra.gmra.mrb[0].mxu1 %vm367_vm0, %v407_v9 }
  0x94   : > { %1413 = vmatprep.subr.mxu0 %v1549_v0  ;;  %1409 = vmatpush3.xpose.msk.msra.mxu1 %vm367_vm0, %v394_v10 }
  0x95   : > { %1410 = vmatprep.mubr.msk.f32.mxu1 %vm1550_vm1, %v1549_v0  ;;  %1418 = vmatprep.subr.mxu1 %v1549_v0 }
  0x96   : > { %v408_v12 = vld [vmem:[#allocation2 + $0x10] sm:$0xff] }
  0x97   : > { %1406 = vmatmul.mubr.msk.f32.vlgmr.msra.gmra.mrb[2].mxu0 %vm367_vm0, %v408_v12  ;;  %1411 = vmatmul.mubr.msk.f32.vlgmr.msra.gmra.mrb[2].mxu1 %vm367_vm0, %v409_v11  ;;  %v776_v12 = vld [vmem:[#allocation4 + $0x8] sm:$0xff] }
  0x98   : > { %1415 = vmatprep.mubr.msk.f32.mxu0 %vm1550_vm1, %v1549_v0  ;;  %1420 = vmatprep.mubr.msk.f32.mxu1 %vm1550_vm1, %v1549_v0 }
  0x99   : > { %1414 = vmatpush3.msra.mxu0 %v395_v31 }
  0x9a   : > { %1423 = vmatprep.subr.mxu0 %v1549_v0 }
  0xf3   : > { %v482_v14 = vpop.f32.mrb[0].mxu0 }
  0xf4   : > { %v715_v15 = vsel %vm367_vm0, %v482_v14, -inf  ;;  %v1397_v16 = vpop.f32.mrb[1].mxu0 }
  0xf5   : > { %716 = vmax.xlane.f32.xlu0 %v715_v15 }
 0x166   : > { %v557_v18 = vpop.f32.mrb[0].mxu1 }
 0x167   : > { %v1402_v19 = vpop.f32.mrb[1].mxu1  ;;  %v718_v20 = vsel %vm367_vm0, %v557_v18, -inf }
 0x168   : > { %719 = vmax.xlane.f32.xlu1 %v718_v20  ;;  %v778_v19 = vld [vmem:[#allocation4 + $0x18] sm:$0xff] }
 0x16a   : > { %v632_v21 = vpop.f32.mrb[2].mxu0  ;;  %v707_v22 = vpop.f32.mrb[2].mxu1 }
 0x16b   : > { %v1407_v23 = vpop.f32.mrb[3].mxu0  ;;  %v721_v24 = vsel %vm367_vm0, %v632_v21, -inf  ;;  %v1412_v25 = vpop.f32.mrb[3].mxu1  ;;  %v724_v26 = vsel %vm367_vm0, %v707_v22, -inf }
 0x16c   : > { %722 = vmax.xlane.f32.xlu0 %v721_v24  ;;  %v775_v24 = vld [vmem:[#allocation4] sm:$0xff] }
 0x170   : > { %725 = vmax.xlane.f32.xlu0 %v724_v26 }
 0x182   : > { %v717_v28 = vpop.xlane.xlu0 %716 }
 0x183   : > { %v1690_v29 = vmax.f32 %v1687_v27, %v717_v28 }
 0x185   : > { %v731_v30 = vsub.f32 %v1687_v27, %v1690_v29  ;;  %1132 = vst.msk [vmem:[#allocation3] sm:$0xff] %vm358_vm2, %v1690_v29  ;;  %745 = vperm.xlu1 %1483, %v1690_v29  }
 0x187   : > { %v735_v11 = vmul.f32 1.442695, %v731_v30 }
 0x1f5   : > { %v720_v33 = vpop.xlane.xlu1 %719 }
 0x1f6   : > { %v728_v34 = vmax.f32 %v712_v32, %v720_v33  ;;  %v1097_v33 = vld [vmem:[#allocation5 + $0x8] sm:$0xff] }
 0x1f8   : > { %v732_v36 = vsub.f32 %v712_v32, %v728_v34  ;;  %1133 = vst.msk [vmem:[#allocation3 + $0x8] sm:$0xff] %vm358_vm2, %v728_v34  ;;  %750 = vperm.xlu0 %1484, %v728_v34  }
 0x1f9   : > { %v723_v37 = vpop.xlane.xlu0 %722 }
 0x1fa   : > { %v729_v38 = vmax.f32 %v713_v35, %v723_v37  ;;  %v737_v3 = vmul.f32 1.442695, %v732_v36  ;;  %v1098_v36 = vld [vmem:[#allocation5 + $0x10] sm:$0xff] }
 0x1fc   : > { %v733_v40 = vsub.f32 %v713_v35, %v729_v38  ;;  %1134 = vst.msk [vmem:[#allocation3 + $0x10] sm:$0xff] %vm358_vm2, %v729_v38  ;;  %755 = vperm.xlu1 %1483, %v729_v38  }
 0x1fd   : > { %v726_v41 = vpop.xlane.xlu0 %725 }
 0x1fe   : > { %v730_v42 = vmax.f32 %v714_v39, %v726_v41  ;;  %v739_v5 = vmul.f32 1.442695, %v733_v40 }
 0x200   : > { %v734_v43 = vsub.f32 %v714_v39, %v730_v42  ;;  %1135 = vst.msk [vmem:[#allocation3 + $0x18] sm:$0xff] %vm358_vm2, %v730_v42  ;;  %760 = vperm.xlu1 %1483, %v730_v42   ;;  %v1099_v42 = vld [vmem:[#allocation5 + $0x18] sm:$0xff] }
 0x204   : > { %397 = vrot.lane.b32.xlu1 %v395_v31, %s1551_s28  ;;  %v746_v44 = vpop.permute.xlu1 %745  ;;  %s351_s28 = sadd.s32 %s1361_s27, %s1773_s12 }
 0x205   : > { %v763_v45 = vsub.f32 %v482_v14, %v746_v44  ;;  %v777_v14 = vld [vmem:[#allocation4 + $0x10] sm:$0xff] }
 0x207   : > { %v767_v46 = vmul.f32 1.442695, %v763_v45 }
 0x208   : > { %400 = vrot.lane.b32.xlu1 %v395_v31, %s1553_s6 }
 0x209   : > { %1485 = vpow2.f32 %v767_v46 }
 0x20c   : > { %403 = vrot.lane.b32.xlu1 %v395_v31, %s1552_s29  ;;  %s1362_s29 = sshll.u32 %s351_s28, 3 }
 0x20d   : > { %s353_s5 = scalar_lea.vmem %s1761_s3, %s1362_s29 }
 0x213   : > { %v1486_v47 = vpop.eup %1485 }
 0x214   : > { %1416 = vmatmul.mubr.msk.f32.vlgmr.msra.gmra.mrb[4].mxu0 %vm367_vm0, %v1486_v47  ;;  %v783_v4 = vsel %vm367_vm0, %v1486_v47, 0.0 }
 0x215   : > { %1425 = vmatprep.mubr.msk.f32.mxu0 %vm1550_vm1, %v1549_v0 }
 0x277   : > { %v751_v48 = vpop.permute.xlu0 %750 }
 0x278   : > { %v764_v49 = vsub.f32 %v557_v18, %v751_v48 }
 0x27a   : > { %v769_v50 = vmul.f32 1.442695, %v764_v49 }
 0x27b   : > { %v756_v51 = vpop.permute.xlu1 %755 }
 0x27c   : > { %v765_v52 = vsub.f32 %v632_v21, %v756_v51  ;;  %1487 = vpow2.f32 %v769_v50 }
 0x27e   : > { %v771_v53 = vmul.f32 1.442695, %v765_v52 }
 0x27f   : > { %v761_v54 = vpop.permute.xlu1 %760 }
 0x280   : > { %1489 = vpow2.f32 %v771_v53  ;;  %v766_v55 = vsub.f32 %v707_v22, %v761_v54  ;;  %v1096_v53 = vld [vmem:[#allocation5] sm:$0xff] }
 0x282   : > { %v773_v56 = vmul.f32 1.442695, %v766_v55 }
 0x283   : > { %v398_v57 = vpop.permute.xlu1 %397 }
 0x284   : > { %1491 = vpow2.f32 %v773_v56  ;;  %1419 = vmatpush3.msra.mxu1 %v398_v57 }
 0x285   : > { %1428 = vmatprep.subr.mxu1 %v1549_v0  ;;  %1493 = vpow2.f32 %v737_v3 }
 0x286   : > { %v1488_v58 = vpop.eup %1487  ;;  %1495 = vpow2.f32 %v739_v5 }
 0x287   : > { %v401_v59 = vpop.permute.xlu1 %400  ;;  %1421 = vmatmul.mubr.msk.f32.vlgmr.msra.gmra.mrb[4].mxu1 %vm367_vm0, %v1488_v58  ;;  %v786_v60 = vsel %vm367_vm0, %v1488_v58, 0.0 }
 0x288   : > { %1424 = vmatpush3.msra.mxu0 %v401_v59  ;;  %787 = vadd.xlane.f32.xlu1 %v786_v60 }
 0x289   : > { %1430 = vmatprep.mubr.msk.f32.mxu1 %vm1550_vm1, %v1549_v0  ;;  %v741_v0 = vmul.f32 1.442695, %v734_v43 }
 0x28a   : > { %v1490_v61 = vpop.eup %1489 }
 0x28b   : > { %1426 = vmatmul.mubr.msk.f32.vlgmr.msra.gmra.mrb[6].mxu0 %vm367_vm0, %v1490_v61  ;;  %v789_v62 = vsel %vm367_vm0, %v1490_v61, 0.0  ;;  %v404_v63 = vpop.permute.xlu1 %403  ;;  %1497 = vpow2.f32 %v741_v0 }
 0x28c   : > { %790 = vadd.xlane.f32.xlu0 %v789_v62  ;;  %1429 = vmatpush3.msra.mxu1 %v404_v63  ;;  %1499 = vpow2.f32 %v735_v11 }
 0x28e   : > { %v1492_v1 = vpop.eup %1491 }
 0x28f   : > { %1431 = vmatmul.mubr.msk.f32.vlgmr.msra.gmra.mrb[6].mxu1 %vm367_vm0, %v1492_v1  ;;  %v792_v2 = vsel %vm367_vm0, %v1492_v1, 0.0  ;;  %v1494_v6 = vpop.eup %1493 }
 0x290   : > { %793 = vadd.xlane.f32.xlu1 %v792_v2  ;;  %v1496_v7 = vpop.eup %1495  ;;  %v780_v13 = vmul.f32 %v1494_v6, %v776_v12 }
 0x291   : > { %v781_v17 = vmul.f32 %v1496_v7, %v777_v14 }
 0x294   : > { %784 = vadd.xlane.f32.xlu1 %v783_v4 }
 0x295   : > { %v1498_v8 = vpop.eup %1497 }
 0x296   : > { %v782_v21 = vmul.f32 %v1498_v8, %v778_v19  ;;  %v1500_v22 = vpop.eup %1499 }
 0x297   : > { %v779_v27 = vmul.f32 %v1500_v22, %v775_v24 }
 0x2a2   : > { %1107 = vperm.xlu0 %1484, %v1494_v6  }
 0x2a5   : > { %1112 = vperm.xlu1 %1483, %v1496_v7  }
 0x2a6   : > { %1117 = vperm.xlu0 %1484, %v1498_v8  }
 0x2e7   : > { %v1722_v9 = vpop.f32.mrb[4].mxu0 }
 0x2e8   : > { %v1417_v10 = vpop.f32.mrb[5].mxu0 }
 0x315   : > { %v788_v15 = vpop.xlane.xlu1 %787 }
 0x316   : > { %v796_v16 = vadd.f32 %v788_v15, %v780_v13 }
 0x318   : > { %801 = vst.msk [vmem:[#allocation4 + $0x8] sm:$0xff] %vm358_vm2, %v796_v16 }
 0x319   : > { %v791_v18 = vpop.xlane.xlu0 %790 }
 0x31a   : > { %v797_v20 = vadd.f32 %v791_v18, %v781_v17 }
 0x31c   : > { %802 = vst.msk [vmem:[#allocation4 + $0x10] sm:$0xff] %vm358_vm2, %v797_v20 }
 0x31d   : > { %v794_v23 = vpop.xlane.xlu1 %793 }
 0x31e   : > { %v798_v25 = vadd.f32 %v794_v23, %v782_v21 }
 0x31f   : > { %v1144_v26 = vld [vmem:[#allocation4 + $0x8] sm:$0xff] }
 0x320   : > { %803 = vst.msk [vmem:[#allocation4 + $0x18] sm:$0xff] %vm358_vm2, %v798_v25  ;;  %1154 = vperm.xlu1 %1483, %v1144_v26  }
 0x321   : > { %v785_v28 = vpop.xlane.xlu1 %784  ;;  %v1108_v34 = vpop.permute.xlu0 %1107 }
 0x322   : > { %v795_v29 = vadd.f32 %v785_v28, %v779_v27  ;;  %v1121_v35 = vmul.f32 %v1108_v34, %v1097_v33 }
 0x323   : > { %v1145_v30 = vld [vmem:[#allocation4 + $0x10] sm:$0xff] }
 0x324   : > { %800 = vst.msk [vmem:[#allocation4] sm:$0xff] %vm358_vm2, %v795_v29  ;;  %1159 = vperm.xlu1 %1483, %v1145_v30  }
 0x325   : > { %v1113_v37 = vpop.permute.xlu1 %1112  ;;  %v1118_v43 = vpop.permute.xlu0 %1117 }
 0x326   : > { %v1122_v41 = vmul.f32 %v1113_v37, %v1098_v36  ;;  %v1123_v47 = vmul.f32 %v1118_v43, %v1099_v42 }
 0x327   : > { %v1146_v31 = vld [vmem:[#allocation4 + $0x18] sm:$0xff] }
 0x328   : > { %1164 = vperm.xlu0 %1484, %v1146_v31   ;;  %1102 = vperm.xlu1 %1483, %v1500_v22  }
 0x32b   : > { %v1143_v32 = vld [vmem:[#allocation4] sm:$0xff] }
 0x32c   : > { %1149 = vperm.xlu0 %1484, %v1143_v32  }
 0x35a   : > { %v946_v38 = vpop.f32.mrb[4].mxu1 }
 0x35b   : > { %v1125_v39 = vadd.f32 %v1121_v35, %v946_v38  ;;  %v1422_v40 = vpop.f32.mrb[5].mxu1 }
 0x35d   : > { %1129 = vst.msk [vmem:[#allocation5 + $0x8] sm:$0xff] %vm367_vm0, %v1125_v39 }
 0x35e   : > { %v1019_v44 = vpop.f32.mrb[6].mxu0 }
 0x35f   : > { %v1126_v45 = vadd.f32 %v1122_v41, %v1019_v44  ;;  %v1427_v46 = vpop.f32.mrb[7].mxu0 }
 0x361   : > { %1130 = vst.msk [vmem:[#allocation5 + $0x10] sm:$0xff] %vm367_vm0, %v1126_v45 }
 0x362   : > { %v1092_v48 = vpop.f32.mrb[6].mxu1 }
 0x363   : > { %v1127_v49 = vadd.f32 %v1123_v47, %v1092_v48  ;;  %v1432_v50 = vpop.f32.mrb[7].mxu1 }
 0x364   : > { %v1140_v59 = vld [vmem:[#allocation5 + $0x8] sm:$0xff] }
 0x365   : > { %1131 = vst.msk [vmem:[#allocation5 + $0x18] sm:$0xff] %vm367_vm0, %v1127_v49 }
 0x368   : > { %v1141_v62 = vld [vmem:[#allocation5 + $0x10] sm:$0xff] }
 0x36c   : > { %v1142_v2 = vld [vmem:[#allocation5 + $0x18] sm:$0xff] }
 0x39f   : > { %v1155_v51 = vpop.permute.xlu1 %1154 }
 0x3a0   : > { %1501 = vrcp.f32 %v1155_v51 }
 0x3a3   : > { %v1160_v52 = vpop.permute.xlu1 %1159 }
 0x3a4   : > { %1503 = vrcp.f32 %v1160_v52 }
 0x3a7   : > { %v1165_v54 = vpop.permute.xlu0 %1164  ;;  %v1103_v55 = vpop.permute.xlu1 %1102 }
 0x3a8   : > { %1505 = vrcp.f32 %v1165_v54  ;;  %v1120_v56 = vmul.f32 %v1103_v55, %v1096_v53 }
 0x3aa   : > { %v1502_v57 = vpop.eup %1501  ;;  %v1124_v58 = vadd.f32 %v1120_v56, %v1722_v9 }
 0x3ab   : > { %v1170_v60 = vmul.f32 %v1502_v57, %v1140_v59  ;;  %v1150_v4 = vpop.permute.xlu0 %1149 }
 0x3ac   : > { %1128 = vst.msk [vmem:[#allocation5] sm:$0xff] %vm367_vm0, %v1124_v58  ;;  %1507 = vrcp.f32 %v1150_v4 }
 0x3ad   : > { %1176 = vrot.lane.b32.xlu1 %v1170_v60, %s1556_s19 }
 0x3ae   : > { %v1504_v61 = vpop.eup %1503 }
 0x3af   : > { %v1172_v63 = vmul.f32 %v1504_v61, %v1141_v62 }
 0x3b1   : > { %1180 = vrot.lane.b32.xlu0 %v1172_v63, %s1557_s25 }
 0x3b2   : > { %v1506_v1 = vpop.eup %1505 }
 0x3b3   : > { %v1174_v3 = vmul.f32 %v1506_v1, %v1142_v2  ;;  %v1139_v6 = vld [vmem:[#allocation5] sm:$0xff] }
 0x3b5   : > { %1184 = vrot.lane.b32.xlu1 %v1174_v3, %s1558_s26 }
 0x3b6   : > { %v1508_v5 = vpop.eup %1507 }
 0x3b7   : > { %v1168_v7 = vmul.f32 %v1508_v5, %v1139_v6 }
 0x41f   : > { %v1177_v0 = vpop.permute.xlu1 %1176 }
 0x420   : > { %v1187_v9 = vsel %vm367_vm0, %v1168_v7, %v1177_v0 }
 0x423   : > { %v1181_v8 = vpop.permute.xlu0 %1180 }
 0x424   : > { %v1189_v10 = vsel %vm1188_vm3, %v1187_v9, %v1181_v8 }
 0x427   : > { %v1185_v11 = vpop.permute.xlu1 %1184 }
 0x428   : > { %v1191_v12 = vsel %vm1190_vm4, %v1189_v10, %v1185_v11 }
 0x429   : > { %1193 = vst.msk [vmem:[%s353_s5] sm:$0xff] %vm1192_vm5, %v1191_v12 }
 0x42a PF: > { %s13_s16 = sadd.s32 1, %s1547_s16   ;;  %s1762_s12 = smov %s1539_s14 }
 0x42b   : > { %p10_p10 = scmp.ge.s32.totalorder %s13_s16, 6   ;;  %s1763_s13 = smov %s1543_s15 }
 0x42c   : > { %s1764_s14 = smov %s1767_s17  ;;  %s1765_s15 = smov %s1771_s18 }
 0x42d   :  { %12 = sbr.rel (!%p10_p10) target bundleno = 3 (0x3), region = 76 }

</bundles_post_ra>
